<compile_context>
chip_gen: v5e
topology: v5e:2x2
jax: 0.10.0
libtpu: 0.0.40
codegen_flags: <defaults>
</compile_context>

<pallas_src>
import functools

import jax
import jax.numpy as jnp
from jax.experimental import pallas as pl
from jax.experimental.pallas import tpu as pltpu


# ---------------------------------------------------------------------------
# helpers
# ---------------------------------------------------------------------------
def _round_up(x, m):
    return ((x + m - 1) // m) * m


@functools.lru_cache(maxsize=None)
def _prefer_256_cols():
    """256-wide output tiles fill the v6e/v7x 256x256 MXU; keep 128 on v5e."""
    try:
        kind = jax.devices()[0].device_kind.lower()
        return not ("v5 lite" in kind or "v5e" in kind)
    except Exception:
        return True


def _row_tile(m, row_bytes=0):
    """Row tile: multiple of 8, up to 512 (big tiles amortize the ~0.35us
    per-grid-step overhead), clamped so the double-buffered per-step input
    stays under ~12 MiB of VMEM."""
    tm = min(512, _round_up(m, 8))
    if row_bytes:
        budget = (12 * 1024 * 1024) // (2 * row_bytes)
        tm = min(tm, max(8, (budget // 8) * 8))
    tm = min(tm, _round_up(m, 8))
    return tm, _round_up(m, tm)


def _col_tile(cout):
    """Output-channel tile: 256 on v6e/v7x when divisible, else 128, else full."""
    if _prefer_256_cols() and cout % 256 == 0:
        return 256
    if cout % 128 == 0:
        return 128
    return cout


def _lane_pad(cout):
    """Pad narrow output widths up to 128 lanes so stores are unmasked."""
    return cout if cout >= 128 else _round_up(cout, 128)


def _score_tile(n):
    for t in (512, 256, 128, 64, 32, 16, 8):
        if n % t == 0:
            return t
    return n


# ---------------------------------------------------------------------------
# Pallas kernel 1: kNN neighbor scores (tiled).
#   score[b, i, j] = 2 * x_i . x_j - ||x_j||^2
# (the -||x_i||^2 term of the true negative squared distance is a per-row
#  constant, so per-row top-k over j is unchanged; operands are bf16 for the
#  MXU, the combine and the stored scores stay f32.)
# ---------------------------------------------------------------------------
def _knn_score_kernel(xi_ref, xj_ref, sqj_ref, out_ref):
    g = jax.lax.dot_general(                        # x_i @ x_j.T on the MXU (bf16)
        xi_ref[0], xj_ref[0], (((1,), (1,)), ((), ())),
        preferred_element_type=jnp.float32)
    out_ref[0] = (2.0 * g - sqj_ref[0]).astype(out_ref.dtype)


def knn_scores(xt):
    # xt: (B, N, C) bf16 -> (B, N, N) f32
    B, N, C = xt.shape
    xf = xt.astype(jnp.float32)
    sq = jnp.sum(xf * xf, axis=-1)[:, None, :]      # (B, 1, N) f32, in plain JAX
    t = _score_tile(N)
    return pl.pallas_call(
        _knn_score_kernel,
        out_shape=jax.ShapeDtypeStruct((B, N, N), jnp.float32),
        grid=(B, N // t, N // t),
        in_specs=[
            pl.BlockSpec((1, t, C), lambda b, i, j: (b, i, 0)),
            pl.BlockSpec((1, t, C), lambda b, i, j: (b, j, 0)),
            pl.BlockSpec((1, 1, t), lambda b, i, j: (b, 0, j)),
        ],
        out_specs=pl.BlockSpec((1, t, t), lambda b, i, j: (b, i, j)),
        compiler_params=pltpu.CompilerParams(
            dimension_semantics=("parallel", "parallel", "parallel")),
    )(xt, xt, sq)


# ---------------------------------------------------------------------------
# Pallas kernel 2: fused edge-conv
#   out = leaky_relu( max_k( neigh_k @ Wn_s ) + center @ Wc_s + bias )
# BN scale is folded into Wn/Wc outside the kernel; bias + LeakyReLU are
# hoisted after the max over k, which is exact because the center/bias term is
# constant in k and leaky_relu is monotone non-decreasing.
# ---------------------------------------------------------------------------
def _edgeconv_kernel(neigh_ref, cent_ref, wn_ref, wc_ref, bias_ref, out_ref,
                     acc_ref):
    # neigh: (K, tm, C) bf16, cent: (tm, C) bf16, wn/wc: (C, tn) bf16,
    # bias: (1, tn) f32, out: (tm, tn) bf16, acc: (tm, tn) f32 VMEM scratch.
    K = neigh_ref.shape[0]
    wn = wn_ref[...]
    acc_ref[...] = jnp.dot(neigh_ref[0], wn, preferred_element_type=jnp.float32)

    def body(j, carry):
        y = jnp.dot(neigh_ref[j], wn, preferred_element_type=jnp.float32)
        acc_ref[...] = jnp.maximum(acc_ref[...], y)
        return carry

    # fori_loop over a VMEM accumulator keeps live ranges bounded for large k.
    jax.lax.fori_loop(1, K, body, 0, unroll=True)

    z = (acc_ref[...]
         + jnp.dot(cent_ref[...], wc_ref[...], preferred_element_type=jnp.float32)
         + bias_ref[...])
    out_ref[...] = jnp.where(z > 0, z, 0.2 * z).astype(out_ref.dtype)  # LeakyReLU(0.2)


def edgeconv(neigh, cent, wn, wc, bias):
    # neigh: (K, M, C) bf16, cent: (M, C) bf16, wn/wc: (C, Cout) bf16,
    # bias: (1, Cout) f32  ->  (M, Cout) bf16
    K, M, C = neigh.shape
    Cout = wn.shape[1]
    tm, Mp = _row_tile(M, row_bytes=(K + 1) * C * 2)
    if Mp != M:                                    # no-op for typical B*N
        neigh = jnp.pad(neigh, ((0, 0), (0, Mp - M), (0, 0)))
        cent = jnp.pad(cent, ((0, Mp - M), (0, 0)))
    tn = _col_tile(Cout)
    out = pl.pallas_call(
        _edgeconv_kernel,
        out_shape=jax.ShapeDtypeStruct((Mp, Cout), jnp.bfloat16),
        grid=(Mp // tm, Cout // tn),
        in_specs=[
            pl.BlockSpec((K, tm, C), lambda i, j: (0, i, 0)),
            pl.BlockSpec((tm, C), lambda i, j: (i, 0)),
            pl.BlockSpec((C, tn), lambda i, j: (0, j)),
            pl.BlockSpec((C, tn), lambda i, j: (0, j)),
            pl.BlockSpec((1, tn), lambda i, j: (0, j)),
        ],
        out_specs=pl.BlockSpec((tm, tn), lambda i, j: (i, j)),
        scratch_shapes=[pltpu.VMEM((tm, tn), jnp.float32)],
        compiler_params=pltpu.CompilerParams(
            dimension_semantics=("parallel", "parallel"),
            vmem_limit_bytes=32 * 1024 * 1024),    # v7x-safe (64 MiB/TC physical)
    )(neigh, cent, wn, wc, bias)
    return out[:M]


# ---------------------------------------------------------------------------
# Pallas kernel 3: conv5 without materializing the 512-channel concat.
#   out = leaky_relu( sum_p x_p @ W5_p + bias )
# ---------------------------------------------------------------------------
def _pointconv4_kernel(x1_ref, x2_ref, x3_ref, x4_ref,
                       w1_ref, w2_ref, w3_ref, w4_ref, bias_ref, out_ref):
    acc = jnp.dot(x1_ref[...], w1_ref[...], preferred_element_type=jnp.float32)
    acc = acc + jnp.dot(x2_ref[...], w2_ref[...], preferred_element_type=jnp.float32)
    acc = acc + jnp.dot(x3_ref[...], w3_ref[...], preferred_element_type=jnp.float32)
    acc = acc + jnp.dot(x4_ref[...], w4_ref[...], preferred_element_type=jnp.float32)
    z = acc + bias_ref[...]
    out_ref[...] = jnp.where(z > 0, z, 0.2 * z).astype(out_ref.dtype)


def pointconv4(xs, ws, bias):
    # xs: 4 x (M, Ci) bf16, ws: 4 x (Ci, Cout) bf16, bias: (1, Cout) f32 -> (M, Cout) f32
    M = xs[0].shape[0]
    Cout = ws[0].shape[1]
    row_bytes = sum(x.shape[1] for x in xs) * 2
    tm, Mp = _row_tile(M, row_bytes=row_bytes)
    if Mp != M:
        xs = [jnp.pad(x, ((0, Mp - M), (0, 0))) for x in xs]
    tn = _col_tile(Cout)
    in_specs = ([pl.BlockSpec((tm, x.shape[1]), lambda i, j: (i, 0)) for x in xs]
                + [pl.BlockSpec((w.shape[0], tn), lambda i, j: (0, j)) for w in ws]
                + [pl.BlockSpec((1, tn), lambda i, j: (0, j))])
    out = pl.pallas_call(
        _pointconv4_kernel,
        out_shape=jax.ShapeDtypeStruct((Mp, Cout), jnp.float32),
        grid=(Mp // tm, Cout // tn),
        in_specs=in_specs,
        out_specs=pl.BlockSpec((tm, tn), lambda i, j: (i, j)),
        compiler_params=pltpu.CompilerParams(
            dimension_semantics=("parallel", "parallel"),
            vmem_limit_bytes=32 * 1024 * 1024),
    )(*xs, *ws, bias)
    return out[:M]


# ---------------------------------------------------------------------------
# get_graph_feature pieces (PRNet: cat(neighbor, center); the center half is
# handled by the split weight inside the edge-conv kernel, so only neighbors
# are gathered -- in bf16, with only the tiny int32 index tensor transposed).
# ---------------------------------------------------------------------------
def gather_neighbors(xt, k):
    # xt: (B, N, C) bf16 -> (k, B*N, C) bf16
    B, N, C = xt.shape
    scores = knn_scores(xt)                         # (B, N, N) f32  [Pallas]
    # TODO(synk): longer term, make j an "arbitrary" reduction axis of the kNN
    # kernel with a running top-k candidate buffer in VMEM (and fuse the row
    # gather into the edge-conv kernel) so the (B,N,N) scores never hit HBM.
    _, idx = jax.lax.approx_max_k(scores, k, recall_target=0.99)   # (B, N, k)
    idx = idx + (jnp.arange(B, dtype=idx.dtype) * N)[:, None, None]
    idx = jnp.transpose(idx, (2, 0, 1)).reshape(k, B * N)   # tiny int transpose
    return xt.reshape(B * N, C)[idx]                # (k, B*N, C) bf16 gather


# ---------------------------------------------------------------------------
# Parameters (deterministic, synthetic).  BatchNorm is eval-mode: running stats
# folded into a per-channel (scale, bias); scale is later folded into W.
# ---------------------------------------------------------------------------
def _bn_affine(gamma, beta, mean, var, eps=1e-5):
    scale = gamma / jnp.sqrt(var + eps)
    bias = beta - mean * scale
    return scale[None, :], bias[None, :]


def init_params(key, emb_dims=512):
    # (Cin, Cout) for conv1..conv5 (weights stored transposed: rows = in-channels)
    dims = [(6, 64), (128, 64), (128, 128), (256, 256), (512, emb_dims)]
    params = []
    for cin, cout in dims:
        kw, kg, kb, km, kv, key = jax.random.split(key, 6)
        w = jax.random.normal(kw, (cin, cout), jnp.float32) / jnp.sqrt(cin)
        gamma = jax.random.uniform(kg, (cout,), jnp.float32, 0.5, 1.5)
        beta = jax.random.normal(kb, (cout,), jnp.float32) * 0.1
        mean = jax.random.normal(km, (cout,), jnp.float32) * 0.1
        var = jax.random.uniform(kv, (cout,), jnp.float32, 0.5, 1.5)
        scale, bias = _bn_affine(gamma, beta, mean, var)
        params.append((w, scale, bias))
    return params


# ---------------------------------------------------------------------------
# DGCNN forward
# ---------------------------------------------------------------------------
@functools.partial(jax.jit, static_argnums=(2,))
def dgcnn_forward(x, params, k):
    # x: (B, 3, N)  (PyTorch layout)  ->  (B, emb_dims, N)
    B, num_dims, N = x.shape
    cur = jnp.transpose(x, (0, 2, 1)).astype(jnp.bfloat16)    # (B, N, 3) bf16
    # Pad xyz channels 3 -> 8 for aligned tiles; zero channels change neither
    # the kNN scores nor the conv (matching weight rows are zeroed below).
    c_phys = max(8, num_dims)
    if c_phys != num_dims:
        cur = jnp.pad(cur, ((0, 0), (0, 0), (0, c_phys - num_dims)))
    c_log = num_dims                                # logical channel count

    feats = []
    for (w, scale, bias) in params[:4]:
        Cout = w.shape[1]
        ws = w * scale                              # fold BN scale into W (f32)
        wn, wc = ws[:c_log], ws[c_log:]             # neighbor / center halves
        if c_phys != c_log:                         # zero rows for padded channels
            wn = jnp.pad(wn, ((0, c_phys - c_log), (0, 0)))
            wc = jnp.pad(wc, ((0, c_phys - c_log), (0, 0)))
        cout_p = _lane_pad(Cout)                    # lane-dense (>=128) output
        bias_p = bias
        if cout_p != Cout:
            wn = jnp.pad(wn, ((0, 0), (0, cout_p - Cout)))
            wc = jnp.pad(wc, ((0, 0), (0, cout_p - Cout)))
            bias_p = jnp.pad(bias, ((0, 0), (0, cout_p - Cout)))

        neigh = gather_neighbors(cur, k)            # (k, B*N, c_phys) bf16
        cent = cur.reshape(B * N, c_phys)
        out = edgeconv(neigh, cent, wn.astype(jnp.bfloat16),
                       wc.astype(jnp.bfloat16), bias_p)   # (B*N, cout_p) bf16
        out = out[:, :Cout]                         # drop lane padding
        feats.append(out)                           # keep flat (B*N, Cout) bf16
        cur = out.reshape(B, N, Cout)
        c_log = c_phys = Cout

    # conv5: no (B, N, 512) concat -- split W5 row-wise, reduce in one kernel.
    w5, s5, b5 = params[4]
    w5s = w5 * s5
    emb = w5s.shape[1]
    offs = [0]
    for f in feats:
        offs.append(offs[-1] + f.shape[-1])
    w5_parts = [w5s[offs[i]:offs[i + 1]] for i in range(4)]
    emb_p = _lane_pad(emb)
    b5_p = b5
    if emb_p != emb:
        w5_parts = [jnp.pad(wp, ((0, 0), (0, emb_p - emb))) for wp in w5_parts]
        b5_p = jnp.pad(b5, ((0, 0), (0, emb_p - emb)))
    w5_parts = [wp.astype(jnp.bfloat16) for wp in w5_parts]
    emb_out = pointconv4(feats, w5_parts, b5_p)     # (B*N, emb_p) f32  [Pallas]
    emb_out = emb_out[:, :emb].reshape(B, N, emb)
    return jnp.transpose(emb_out, (0, 2, 1))        # (B, emb_dims, N) f32


if __name__ == "__main__":
    key = jax.random.PRNGKey(0)
    kx, kp = jax.random.split(key)

    B, N, k, emb_dims = 2, 16, 4, 64                # small test shapes
    x = jax.random.normal(kx, (B, 3, N), jnp.float32)
    params = init_params(kp, emb_dims=emb_dims)

    out = dgcnn_forward(x, params, k)
    out = jax.block_until_ready(out)
    assert out.shape == (B, emb_dims, N), out.shape
    assert bool(jnp.all(jnp.isfinite(out)))
    print("KERNEL_OK")
</pallas_src>

<mosaic_0001>
module attributes {stable_mosaic.version = 11 : i64} {
  func.func @_knn_score_kernel(%arg0: i32, %arg1: i32, %arg2: i32, %arg3: memref<1x16x8xbf16, #tpu.memory_space<vmem>>, %arg4: memref<1x16x8xbf16, #tpu.memory_space<vmem>>, %arg5: memref<1x1x16xf32, #tpu.memory_space<vmem>>, %arg6: memref<1x16x16xf32, #tpu.memory_space<vmem>>) attributes {dimension_semantics = [#tpu.dimension_semantics<parallel>, #tpu.dimension_semantics<parallel>, #tpu.dimension_semantics<parallel>], iteration_bounds = array<i64: 2, 1, 1>, scalar_prefetch = 0 : i64, scratch_operands = 0 : i64, tpu.core_type = #tpu.core_type<tc>, window_params = [{transform_indices = @transform_0, window_bounds = array<i64: 1, 16, 8>}, {transform_indices = @transform_1, window_bounds = array<i64: 1, 16, 8>}, {transform_indices = @transform_2, window_bounds = array<i64: 1, 1, 16>}, {transform_indices = @transform_3, window_bounds = array<i64: 1, 16, 16>}]} {
    %c0 = arith.constant 0 : index
    %c0_0 = arith.constant 0 : index
    %c0_1 = arith.constant 0 : index
    %0 = vector.load %arg3[%c0, %c0_0, %c0_1] : memref<1x16x8xbf16, #tpu.memory_space<vmem>>, vector<1x16x8xbf16>
    %1 = vector.shape_cast %0 : vector<1x16x8xbf16> to vector<16x8xbf16>
    %c0_2 = arith.constant 0 : index
    %c0_3 = arith.constant 0 : index
    %c0_4 = arith.constant 0 : index
    %2 = vector.load %arg4[%c0_2, %c0_3, %c0_4] : memref<1x16x8xbf16, #tpu.memory_space<vmem>>, vector<1x16x8xbf16>
    %3 = vector.shape_cast %2 : vector<1x16x8xbf16> to vector<16x8xbf16>
    %cst = arith.constant dense<0.000000e+00> : vector<16x16xf32>
    %4 = tpu.matmul %1, %3, %cst {dimension_numbers = #tpu.dot_dimension_numbers<[1], [1], [0], [0], [0, 0, 1, 0], [], []>} : vector<16x8xbf16>, vector<16x8xbf16>, vector<16x16xf32> -> vector<16x16xf32>
    %cst_5 = arith.constant 2.000000e+00 : f32
    %5 = vector.broadcast %cst_5 : f32 to vector<16x16xf32>
    %6 = arith.mulf %5, %4 : vector<16x16xf32>
    %c0_6 = arith.constant 0 : index
    %c0_7 = arith.constant 0 : index
    %c0_8 = arith.constant 0 : index
    %7 = vector.load %arg5[%c0_6, %c0_7, %c0_8] : memref<1x1x16xf32, #tpu.memory_space<vmem>>, vector<1x1x16xf32>
    %8 = vector.shape_cast %7 : vector<1x1x16xf32> to vector<1x16xf32>
    %9 = vector.broadcast %8 : vector<1x16xf32> to vector<16x16xf32>
    %10 = arith.subf %6, %9 : vector<16x16xf32>
    %c0_9 = arith.constant 0 : index
    %c0_10 = arith.constant 0 : index
    %c0_11 = arith.constant 0 : index
    %11 = vector.load %arg6[%c0_9, %c0_10, %c0_11] : memref<1x16x16xf32, #tpu.memory_space<vmem>>, vector<1x16x16xf32>
    %12 = vector.shape_cast %11 : vector<1x16x16xf32> to vector<16x16xf32>
    %13 = vector.shape_cast %10 : vector<16x16xf32> to vector<1x16x16xf32>
    tpu.vector_store %arg6[%c0_9, %c0_10, %c0_11], %13 {strides = array<i32>} : memref<1x16x16xf32, #tpu.memory_space<vmem>>, vector<1x16x16xf32>,
    return
  }
  func.func @transform_0(%arg0: i32, %arg1: i32, %arg2: i32) -> (i32, i32, i32) {
    %c0_i32 = arith.constant 0 : i32
    %c0_i32_0 = arith.constant 0 : i32
    return %arg0, %arg1, %c0_i32 : i32, i32, i32
  }
  func.func @transform_1(%arg0: i32, %arg1: i32, %arg2: i32) -> (i32, i32, i32) {
    %c0_i32 = arith.constant 0 : i32
    %c0_i32_0 = arith.constant 0 : i32
    return %arg0, %arg2, %c0_i32 : i32, i32, i32
  }
  func.func @transform_2(%arg0: i32, %arg1: i32, %arg2: i32) -> (i32, i32, i32) {
    %c0_i32 = arith.constant 0 : i32
    %c0_i32_0 = arith.constant 0 : i32
    return %arg0, %c0_i32, %arg2 : i32, i32, i32
  }
  func.func @transform_3(%arg0: i32, %arg1: i32, %arg2: i32) -> (i32, i32, i32) {
    %c0_i32 = arith.constant 0 : i32
    return %arg0, %arg1, %arg2 : i32, i32, i32
  }
}

module attributes {stable_mosaic.version = 11 : i64} {
  func.func @_edgeconv_kernel(%arg0: i32, %arg1: i32, %arg2: memref<4x32x8xbf16, #tpu.memory_space<vmem>>, %arg3: memref<32x8xbf16, #tpu.memory_space<vmem>>, %arg4: memref<8x128xbf16, #tpu.memory_space<vmem>>, %arg5: memref<8x128xbf16, #tpu.memory_space<vmem>>, %arg6: memref<1x128xf32, #tpu.memory_space<vmem>>, %arg7: memref<32x128xbf16, #tpu.memory_space<vmem>>, %arg8: memref<32x128xf32, #tpu.memory_space<vmem>>) attributes {dimension_semantics = [#tpu.dimension_semantics<parallel>, #tpu.dimension_semantics<parallel>], iteration_bounds = array<i64: 1, 1>, scalar_prefetch = 0 : i64, scratch_operands = 1 : i64, tpu.core_type = #tpu.core_type<tc>, window_params = [{transform_indices = @transform_0, window_bounds = array<i64: 4, 32, 8>}, {transform_indices = @transform_1, window_bounds = array<i64: 32, 8>}, {transform_indices = @transform_2, window_bounds = array<i64: 8, 128>}, {transform_indices = @transform_3, window_bounds = array<i64: 8, 128>}, {transform_indices = @transform_4, window_bounds = array<i64: 1, 128>}, {transform_indices = @transform_5, window_bounds = array<i64: 32, 128>}]} {
    %c0 = arith.constant 0 : index
    %c0_0 = arith.constant 0 : index
    %0 = vector.load %arg4[%c0, %c0_0] : memref<8x128xbf16, #tpu.memory_space<vmem>>, vector<8x128xbf16>
    %c0_1 = arith.constant 0 : index
    %c0_2 = arith.constant 0 : index
    %c0_3 = arith.constant 0 : index
    %1 = vector.load %arg2[%c0_1, %c0_2, %c0_3] : memref<4x32x8xbf16, #tpu.memory_space<vmem>>, vector<1x32x8xbf16>
    %2 = vector.shape_cast %1 : vector<1x32x8xbf16> to vector<32x8xbf16>
    %cst = arith.constant dense<0.000000e+00> : vector<32x128xf32>
    %3 = tpu.matmul %2, %0, %cst {dimension_numbers = #tpu.dot_dimension_numbers<[1], [0], [0], [1], [0, 0, 1, 1], [], []>} : vector<32x8xbf16>, vector<8x128xbf16>, vector<32x128xf32> -> vector<32x128xf32>
    %c0_4 = arith.constant 0 : index
    %c0_5 = arith.constant 0 : index
    %4 = vector.load %arg8[%c0_4, %c0_5] : memref<32x128xf32, #tpu.memory_space<vmem>>, vector<32x128xf32>
    tpu.vector_store %arg8[%c0_4, %c0_5], %3 {strides = array<i32>} : memref<32x128xf32, #tpu.memory_space<vmem>>, vector<32x128xf32>,
    %c1_i32 = arith.constant 1 : i32
    %5 = arith.index_cast %c1_i32 : i32 to index
    %c0_6 = arith.constant 0 : index
    %c0_7 = arith.constant 0 : index
    %6 = vector.load %arg2[%5, %c0_6, %c0_7] : memref<4x32x8xbf16, #tpu.memory_space<vmem>>, vector<1x32x8xbf16>
    %7 = vector.shape_cast %6 : vector<1x32x8xbf16> to vector<32x8xbf16>
    %cst_8 = arith.constant dense<0.000000e+00> : vector<32x128xf32>
    %8 = tpu.matmul %7, %0, %cst_8 {dimension_numbers = #tpu.dot_dimension_numbers<[1], [0], [0], [1], [0, 0, 1, 1], [], []>} : vector<32x8xbf16>, vector<8x128xbf16>, vector<32x128xf32> -> vector<32x128xf32>
    %c0_9 = arith.constant 0 : index
    %c0_10 = arith.constant 0 : index
    %9 = vector.load %arg8[%c0_9, %c0_10] : memref<32x128xf32, #tpu.memory_space<vmem>>, vector<32x128xf32>
    %10 = arith.maximumf %9, %8 : vector<32x128xf32>
    %c0_11 = arith.constant 0 : index
    %c0_12 = arith.constant 0 : index
    %11 = vector.load %arg8[%c0_11, %c0_12] : memref<32x128xf32, #tpu.memory_space<vmem>>, vector<32x128xf32>
    tpu.vector_store %arg8[%c0_11, %c0_12], %10 {strides = array<i32>} : memref<32x128xf32, #tpu.memory_space<vmem>>, vector<32x128xf32>,
    %c2_i32 = arith.constant 2 : i32
    %12 = arith.index_cast %c2_i32 : i32 to index
    %c0_13 = arith.constant 0 : index
    %c0_14 = arith.constant 0 : index
    %13 = vector.load %arg2[%12, %c0_13, %c0_14] : memref<4x32x8xbf16, #tpu.memory_space<vmem>>, vector<1x32x8xbf16>
    %14 = vector.shape_cast %13 : vector<1x32x8xbf16> to vector<32x8xbf16>
    %cst_15 = arith.constant dense<0.000000e+00> : vector<32x128xf32>
    %15 = tpu.matmul %14, %0, %cst_15 {dimension_numbers = #tpu.dot_dimension_numbers<[1], [0], [0], [1], [0, 0, 1, 1], [], []>} : vector<32x8xbf16>, vector<8x128xbf16>, vector<32x128xf32> -> vector<32x128xf32>
    %c0_16 = arith.constant 0 : index
    %c0_17 = arith.constant 0 : index
    %16 = vector.load %arg8[%c0_16, %c0_17] : memref<32x128xf32, #tpu.memory_space<vmem>>, vector<32x128xf32>
    %17 = arith.maximumf %16, %15 : vector<32x128xf32>
    %c0_18 = arith.constant 0 : index
    %c0_19 = arith.constant 0 : index
    %18 = vector.load %arg8[%c0_18, %c0_19] : memref<32x128xf32, #tpu.memory_space<vmem>>, vector<32x128xf32>
    tpu.vector_store %arg8[%c0_18, %c0_19], %17 {strides = array<i32>} : memref<32x128xf32, #tpu.memory_space<vmem>>, vector<32x128xf32>,
    %c3_i32 = arith.constant 3 : i32
    %19 = arith.index_cast %c3_i32 : i32 to index
    %c0_20 = arith.constant 0 : index
    %c0_21 = arith.constant 0 : index
    %20 = vector.load %arg2[%19, %c0_20, %c0_21] : memref<4x32x8xbf16, #tpu.memory_space<vmem>>, vector<1x32x8xbf16>
    %21 = vector.shape_cast %20 : vector<1x32x8xbf16> to vector<32x8xbf16>
    %cst_22 = arith.constant dense<0.000000e+00> : vector<32x128xf32>
    %22 = tpu.matmul %21, %0, %cst_22 {dimension_numbers = #tpu.dot_dimension_numbers<[1], [0], [0], [1], [0, 0, 1, 1], [], []>} : vector<32x8xbf16>, vector<8x128xbf16>, vector<32x128xf32> -> vector<32x128xf32>
    %c0_23 = arith.constant 0 : index
    %c0_24 = arith.constant 0 : index
    %23 = vector.load %arg8[%c0_23, %c0_24] : memref<32x128xf32, #tpu.memory_space<vmem>>, vector<32x128xf32>
    %24 = arith.maximumf %23, %22 : vector<32x128xf32>
    %c0_25 = arith.constant 0 : index
    %c0_26 = arith.constant 0 : index
    %25 = vector.load %arg8[%c0_25, %c0_26] : memref<32x128xf32, #tpu.memory_space<vmem>>, vector<32x128xf32>
    tpu.vector_store %arg8[%c0_25, %c0_26], %24 {strides = array<i32>} : memref<32x128xf32, #tpu.memory_space<vmem>>, vector<32x128xf32>,
    %c3_i32_27 = arith.constant 3 : i32
    %c0_28 = arith.constant 0 : index
    %c0_29 = arith.constant 0 : index
    %26 = vector.load %arg8[%c0_28, %c0_29] : memref<32x128xf32, #tpu.memory_space<vmem>>, vector<32x128xf32>
    %c0_30 = arith.constant 0 : index
    %c0_31 = arith.constant 0 : index
    %27 = vector.load %arg3[%c0_30, %c0_31] : memref<32x8xbf16, #tpu.memory_space<vmem>>, vector<32x8xbf16>
    %c0_32 = arith.constant 0 : index
    %c0_33 = arith.constant 0 : index
    %28 = vector.load %arg5[%c0_32, %c0_33] : memref<8x128xbf16, #tpu.memory_space<vmem>>, vector<8x128xbf16>
    %cst_34 = arith.constant dense<0.000000e+00> : vector<32x128xf32>
    %29 = tpu.matmul %27, %28, %cst_34 {dimension_numbers = #tpu.dot_dimension_numbers<[1], [0], [0], [1], [0, 0, 1, 1], [], []>} : vector<32x8xbf16>, vector<8x128xbf16>, vector<32x128xf32> -> vector<32x128xf32>
    %30 = arith.addf %26, %29 : vector<32x128xf32>
    %c0_35 = arith.constant 0 : index
    %c0_36 = arith.constant 0 : index
    %31 = vector.load %arg6[%c0_35, %c0_36] : memref<1x128xf32, #tpu.memory_space<vmem>>, vector<1x128xf32>
    %32 = vector.broadcast %31 : vector<1x128xf32> to vector<32x128xf32>
    %33 = arith.addf %30, %32 : vector<32x128xf32>
    %cst_37 = arith.constant 0.000000e+00 : f32
    %34 = vector.broadcast %cst_37 : f32 to vector<32x128xf32>
    %35 = arith.cmpf ogt, %33, %34 : vector<32x128xf32>
    %cst_38 = arith.constant 2.000000e-01 : f32
    %36 = vector.broadcast %cst_38 : f32 to vector<32x128xf32>
    %37 = arith.mulf %36, %33 : vector<32x128xf32>
    %38 = arith.select %35, %33, %37 : vector<32x128xi1>, vector<32x128xf32>
    %39 = arith.truncf %38 : vector<32x128xf32> to vector<32x128xbf16>
    %c0_39 = arith.constant 0 : index
    %c0_40 = arith.constant 0 : index
    %40 = vector.load %arg7[%c0_39, %c0_40] : memref<32x128xbf16, #tpu.memory_space<vmem>>, vector<32x128xbf16>
    tpu.vector_store %arg7[%c0_39, %c0_40], %39 {strides = array<i32>} : memref<32x128xbf16, #tpu.memory_space<vmem>>, vector<32x128xbf16>,
    return
  }
  func.func @transform_0(%arg0: i32, %arg1: i32) -> (i32, i32, i32) {
    %c0_i32 = arith.constant 0 : i32
    %c0_i32_0 = arith.constant 0 : i32
    %c0_i32_1 = arith.constant 0 : i32
    return %c0_i32, %arg0, %c0_i32_0 : i32, i32, i32
  }
  func.func @transform_1(%arg0: i32, %arg1: i32) -> (i32, i32) {
    %c0_i32 = arith.constant 0 : i32
    %c0_i32_0 = arith.constant 0 : i32
    return %arg0, %c0_i32 : i32, i32
  }
  func.func @transform_2(%arg0: i32, %arg1: i32) -> (i32, i32) {
    %c0_i32 = arith.constant 0 : i32
    %c0_i32_0 = arith.constant 0 : i32
    return %c0_i32, %arg1 : i32, i32
  }
  func.func @transform_3(%arg0: i32, %arg1: i32) -> (i32, i32) {
    %c0_i32 = arith.constant 0 : i32
    %c0_i32_0 = arith.constant 0 : i32
    return %c0_i32, %arg1 : i32, i32
  }
  func.func @transform_4(%arg0: i32, %arg1: i32) -> (i32, i32) {
    %c0_i32 = arith.constant 0 : i32
    %c0_i32_0 = arith.constant 0 : i32
    return %c0_i32, %arg1 : i32, i32
  }
  func.func @transform_5(%arg0: i32, %arg1: i32) -> (i32, i32) {
    %c0_i32 = arith.constant 0 : i32
    return %arg0, %arg1 : i32, i32
  }
}

module attributes {stable_mosaic.version = 11 : i64} {
  func.func @_knn_score_kernel(%arg0: i32, %arg1: i32, %arg2: i32, %arg3: memref<1x16x64xbf16, #tpu.memory_space<vmem>>, %arg4: memref<1x16x64xbf16, #tpu.memory_space<vmem>>, %arg5: memref<1x1x16xf32, #tpu.memory_space<vmem>>, %arg6: memref<1x16x16xf32, #tpu.memory_space<vmem>>) attributes {dimension_semantics = [#tpu.dimension_semantics<parallel>, #tpu.dimension_semantics<parallel>, #tpu.dimension_semantics<parallel>], iteration_bounds = array<i64: 2, 1, 1>, scalar_prefetch = 0 : i64, scratch_operands = 0 : i64, tpu.core_type = #tpu.core_type<tc>, window_params = [{transform_indices = @transform_0, window_bounds = array<i64: 1, 16, 64>}, {transform_indices = @transform_1, window_bounds = array<i64: 1, 16, 64>}, {transform_indices = @transform_2, window_bounds = array<i64: 1, 1, 16>}, {transform_indices = @transform_3, window_bounds = array<i64: 1, 16, 16>}]} {
    %c0 = arith.constant 0 : index
    %c0_0 = arith.constant 0 : index
    %c0_1 = arith.constant 0 : index
    %0 = vector.load %arg3[%c0, %c0_0, %c0_1] : memref<1x16x64xbf16, #tpu.memory_space<vmem>>, vector<1x16x64xbf16>
    %1 = vector.shape_cast %0 : vector<1x16x64xbf16> to vector<16x64xbf16>
    %c0_2 = arith.constant 0 : index
    %c0_3 = arith.constant 0 : index
    %c0_4 = arith.constant 0 : index
    %2 = vector.load %arg4[%c0_2, %c0_3, %c0_4] : memref<1x16x64xbf16, #tpu.memory_space<vmem>>, vector<1x16x64xbf16>
    %3 = vector.shape_cast %2 : vector<1x16x64xbf16> to vector<16x64xbf16>
    %cst = arith.constant dense<0.000000e+00> : vector<16x16xf32>
    %4 = tpu.matmul %1, %3, %cst {dimension_numbers = #tpu.dot_dimension_numbers<[1], [1], [0], [0], [0, 0, 1, 0], [], []>} : vector<16x64xbf16>, vector<16x64xbf16>, vector<16x16xf32> -> vector<16x16xf32>
    %cst_5 = arith.constant 2.000000e+00 : f32
    %5 = vector.broadcast %cst_5 : f32 to vector<16x16xf32>
    %6 = arith.mulf %5, %4 : vector<16x16xf32>
    %c0_6 = arith.constant 0 : index
    %c0_7 = arith.constant 0 : index
    %c0_8 = arith.constant 0 : index
    %7 = vector.load %arg5[%c0_6, %c0_7, %c0_8] : memref<1x1x16xf32, #tpu.memory_space<vmem>>, vector<1x1x16xf32>
    %8 = vector.shape_cast %7 : vector<1x1x16xf32> to vector<1x16xf32>
    %9 = vector.broadcast %8 : vector<1x16xf32> to vector<16x16xf32>
    %10 = arith.subf %6, %9 : vector<16x16xf32>
    %c0_9 = arith.constant 0 : index
    %c0_10 = arith.constant 0 : index
    %c0_11 = arith.constant 0 : index
    %11 = vector.load %arg6[%c0_9, %c0_10, %c0_11] : memref<1x16x16xf32, #tpu.memory_space<vmem>>, vector<1x16x16xf32>
    %12 = vector.shape_cast %11 : vector<1x16x16xf32> to vector<16x16xf32>
    %13 = vector.shape_cast %10 : vector<16x16xf32> to vector<1x16x16xf32>
    tpu.vector_store %arg6[%c0_9, %c0_10, %c0_11], %13 {strides = array<i32>} : memref<1x16x16xf32, #tpu.memory_space<vmem>>, vector<1x16x16xf32>,
    return
  }
  func.func @transform_0(%arg0: i32, %arg1: i32, %arg2: i32) -> (i32, i32, i32) {
    %c0_i32 = arith.constant 0 : i32
    %c0_i32_0 = arith.constant 0 : i32
    return %arg0, %arg1, %c0_i32 : i32, i32, i32
  }
  func.func @transform_1(%arg0: i32, %arg1: i32, %arg2: i32) -> (i32, i32, i32) {
    %c0_i32 = arith.constant 0 : i32
    %c0_i32_0 = arith.constant 0 : i32
    return %arg0, %arg2, %c0_i32 : i32, i32, i32
  }
  func.func @transform_2(%arg0: i32, %arg1: i32, %arg2: i32) -> (i32, i32, i32) {
    %c0_i32 = arith.constant 0 : i32
    %c0_i32_0 = arith.constant 0 : i32
    return %arg0, %c0_i32, %arg2 : i32, i32, i32
  }
  func.func @transform_3(%arg0: i32, %arg1: i32, %arg2: i32) -> (i32, i32, i32) {
    %c0_i32 = arith.constant 0 : i32
    return %arg0, %arg1, %arg2 : i32, i32, i32
  }
}

module attributes {stable_mosaic.version = 11 : i64} {
  func.func @_edgeconv_kernel(%arg0: i32, %arg1: i32, %arg2: memref<4x32x64xbf16, #tpu.memory_space<vmem>>, %arg3: memref<32x64xbf16, #tpu.memory_space<vmem>>, %arg4: memref<64x128xbf16, #tpu.memory_space<vmem>>, %arg5: memref<64x128xbf16, #tpu.memory_space<vmem>>, %arg6: memref<1x128xf32, #tpu.memory_space<vmem>>, %arg7: memref<32x128xbf16, #tpu.memory_space<vmem>>, %arg8: memref<32x128xf32, #tpu.memory_space<vmem>>) attributes {dimension_semantics = [#tpu.dimension_semantics<parallel>, #tpu.dimension_semantics<parallel>], iteration_bounds = array<i64: 1, 1>, scalar_prefetch = 0 : i64, scratch_operands = 1 : i64, tpu.core_type = #tpu.core_type<tc>, window_params = [{transform_indices = @transform_0, window_bounds = array<i64: 4, 32, 64>}, {transform_indices = @transform_1, window_bounds = array<i64: 32, 64>}, {transform_indices = @transform_2, window_bounds = array<i64: 64, 128>}, {transform_indices = @transform_3, window_bounds = array<i64: 64, 128>}, {transform_indices = @transform_4, window_bounds = array<i64: 1, 128>}, {transform_indices = @transform_5, window_bounds = array<i64: 32, 128>}]} {
    %c0 = arith.constant 0 : index
    %c0_0 = arith.constant 0 : index
    %0 = vector.load %arg4[%c0, %c0_0] : memref<64x128xbf16, #tpu.memory_space<vmem>>, vector<64x128xbf16>
    %c0_1 = arith.constant 0 : index
    %c0_2 = arith.constant 0 : index
    %c0_3 = arith.constant 0 : index
    %1 = vector.load %arg2[%c0_1, %c0_2, %c0_3] : memref<4x32x64xbf16, #tpu.memory_space<vmem>>, vector<1x32x64xbf16>
    %2 = vector.shape_cast %1 : vector<1x32x64xbf16> to vector<32x64xbf16>
    %cst = arith.constant dense<0.000000e+00> : vector<32x128xf32>
    %3 = tpu.matmul %2, %0, %cst {dimension_numbers = #tpu.dot_dimension_numbers<[1], [0], [0], [1], [0, 0, 1, 1], [], []>} : vector<32x64xbf16>, vector<64x128xbf16>, vector<32x128xf32> -> vector<32x128xf32>
    %c0_4 = arith.constant 0 : index
    %c0_5 = arith.constant 0 : index
    %4 = vector.load %arg8[%c0_4, %c0_5] : memref<32x128xf32, #tpu.memory_space<vmem>>, vector<32x128xf32>
    tpu.vector_store %arg8[%c0_4, %c0_5], %3 {strides = array<i32>} : memref<32x128xf32, #tpu.memory_space<vmem>>, vector<32x128xf32>,
    %c1_i32 = arith.constant 1 : i32
    %5 = arith.index_cast %c1_i32 : i32 to index
    %c0_6 = arith.constant 0 : index
    %c0_7 = arith.constant 0 : index
    %6 = vector.load %arg2[%5, %c0_6, %c0_7] : memref<4x32x64xbf16, #tpu.memory_space<vmem>>, vector<1x32x64xbf16>
    %7 = vector.shape_cast %6 : vector<1x32x64xbf16> to vector<32x64xbf16>
    %cst_8 = arith.constant dense<0.000000e+00> : vector<32x128xf32>
    %8 = tpu.matmul %7, %0, %cst_8 {dimension_numbers = #tpu.dot_dimension_numbers<[1], [0], [0], [1], [0, 0, 1, 1], [], []>} : vector<32x64xbf16>, vector<64x128xbf16>, vector<32x128xf32> -> vector<32x128xf32>
    %c0_9 = arith.constant 0 : index
    %c0_10 = arith.constant 0 : index
    %9 = vector.load %arg8[%c0_9, %c0_10] : memref<32x128xf32, #tpu.memory_space<vmem>>, vector<32x128xf32>
    %10 = arith.maximumf %9, %8 : vector<32x128xf32>
    %c0_11 = arith.constant 0 : index
    %c0_12 = arith.constant 0 : index
    %11 = vector.load %arg8[%c0_11, %c0_12] : memref<32x128xf32, #tpu.memory_space<vmem>>, vector<32x128xf32>
    tpu.vector_store %arg8[%c0_11, %c0_12], %10 {strides = array<i32>} : memref<32x128xf32, #tpu.memory_space<vmem>>, vector<32x128xf32>,
    %c2_i32 = arith.constant 2 : i32
    %12 = arith.index_cast %c2_i32 : i32 to index
    %c0_13 = arith.constant 0 : index
    %c0_14 = arith.constant 0 : index
    %13 = vector.load %arg2[%12, %c0_13, %c0_14] : memref<4x32x64xbf16, #tpu.memory_space<vmem>>, vector<1x32x64xbf16>
    %14 = vector.shape_cast %13 : vector<1x32x64xbf16> to vector<32x64xbf16>
    %cst_15 = arith.constant dense<0.000000e+00> : vector<32x128xf32>
    %15 = tpu.matmul %14, %0, %cst_15 {dimension_numbers = #tpu.dot_dimension_numbers<[1], [0], [0], [1], [0, 0, 1, 1], [], []>} : vector<32x64xbf16>, vector<64x128xbf16>, vector<32x128xf32> -> vector<32x128xf32>
    %c0_16 = arith.constant 0 : index
    %c0_17 = arith.constant 0 : index
    %16 = vector.load %arg8[%c0_16, %c0_17] : memref<32x128xf32, #tpu.memory_space<vmem>>, vector<32x128xf32>
    %17 = arith.maximumf %16, %15 : vector<32x128xf32>
    %c0_18 = arith.constant 0 : index
    %c0_19 = arith.constant 0 : index
    %18 = vector.load %arg8[%c0_18, %c0_19] : memref<32x128xf32, #tpu.memory_space<vmem>>, vector<32x128xf32>
    tpu.vector_store %arg8[%c0_18, %c0_19], %17 {strides = array<i32>} : memref<32x128xf32, #tpu.memory_space<vmem>>, vector<32x128xf32>,
    %c3_i32 = arith.constant 3 : i32
    %19 = arith.index_cast %c3_i32 : i32 to index
    %c0_20 = arith.constant 0 : index
    %c0_21 = arith.constant 0 : index
    %20 = vector.load %arg2[%19, %c0_20, %c0_21] : memref<4x32x64xbf16, #tpu.memory_space<vmem>>, vector<1x32x64xbf16>
    %21 = vector.shape_cast %20 : vector<1x32x64xbf16> to vector<32x64xbf16>
    %cst_22 = arith.constant dense<0.000000e+00> : vector<32x128xf32>
    %22 = tpu.matmul %21, %0, %cst_22 {dimension_numbers = #tpu.dot_dimension_numbers<[1], [0], [0], [1], [0, 0, 1, 1], [], []>} : vector<32x64xbf16>, vector<64x128xbf16>, vector<32x128xf32> -> vector<32x128xf32>
    %c0_23 = arith.constant 0 : index
    %c0_24 = arith.constant 0 : index
    %23 = vector.load %arg8[%c0_23, %c0_24] : memref<32x128xf32, #tpu.memory_space<vmem>>, vector<32x128xf32>
    %24 = arith.maximumf %23, %22 : vector<32x128xf32>
    %c0_25 = arith.constant 0 : index
    %c0_26 = arith.constant 0 : index
    %25 = vector.load %arg8[%c0_25, %c0_26] : memref<32x128xf32, #tpu.memory_space<vmem>>, vector<32x128xf32>
    tpu.vector_store %arg8[%c0_25, %c0_26], %24 {strides = array<i32>} : memref<32x128xf32, #tpu.memory_space<vmem>>, vector<32x128xf32>,
    %c3_i32_27 = arith.constant 3 : i32
    %c0_28 = arith.constant 0 : index
    %c0_29 = arith.constant 0 : index
    %26 = vector.load %arg8[%c0_28, %c0_29] : memref<32x128xf32, #tpu.memory_space<vmem>>, vector<32x128xf32>
    %c0_30 = arith.constant 0 : index
    %c0_31 = arith.constant 0 : index
    %27 = vector.load %arg3[%c0_30, %c0_31] : memref<32x64xbf16, #tpu.memory_space<vmem>>, vector<32x64xbf16>
    %c0_32 = arith.constant 0 : index
    %c0_33 = arith.constant 0 : index
    %28 = vector.load %arg5[%c0_32, %c0_33] : memref<64x128xbf16, #tpu.memory_space<vmem>>, vector<64x128xbf16>
    %cst_34 = arith.constant dense<0.000000e+00> : vector<32x128xf32>
    %29 = tpu.matmul %27, %28, %cst_34 {dimension_numbers = #tpu.dot_dimension_numbers<[1], [0], [0], [1], [0, 0, 1, 1], [], []>} : vector<32x64xbf16>, vector<64x128xbf16>, vector<32x128xf32> -> vector<32x128xf32>
    %30 = arith.addf %26, %29 : vector<32x128xf32>
    %c0_35 = arith.constant 0 : index
    %c0_36 = arith.constant 0 : index
    %31 = vector.load %arg6[%c0_35, %c0_36] : memref<1x128xf32, #tpu.memory_space<vmem>>, vector<1x128xf32>
    %32 = vector.broadcast %31 : vector<1x128xf32> to vector<32x128xf32>
    %33 = arith.addf %30, %32 : vector<32x128xf32>
    %cst_37 = arith.constant 0.000000e+00 : f32
    %34 = vector.broadcast %cst_37 : f32 to vector<32x128xf32>
    %35 = arith.cmpf ogt, %33, %34 : vector<32x128xf32>
    %cst_38 = arith.constant 2.000000e-01 : f32
    %36 = vector.broadcast %cst_38 : f32 to vector<32x128xf32>
    %37 = arith.mulf %36, %33 : vector<32x128xf32>
    %38 = arith.select %35, %33, %37 : vector<32x128xi1>, vector<32x128xf32>
    %39 = arith.truncf %38 : vector<32x128xf32> to vector<32x128xbf16>
    %c0_39 = arith.constant 0 : index
    %c0_40 = arith.constant 0 : index
    %40 = vector.load %arg7[%c0_39, %c0_40] : memref<32x128xbf16, #tpu.memory_space<vmem>>, vector<32x128xbf16>
    tpu.vector_store %arg7[%c0_39, %c0_40], %39 {strides = array<i32>} : memref<32x128xbf16, #tpu.memory_space<vmem>>, vector<32x128xbf16>,
    return
  }
  func.func @transform_0(%arg0: i32, %arg1: i32) -> (i32, i32, i32) {
    %c0_i32 = arith.constant 0 : i32
    %c0_i32_0 = arith.constant 0 : i32
    %c0_i32_1 = arith.constant 0 : i32
    return %c0_i32, %arg0, %c0_i32_0 : i32, i32, i32
  }
  func.func @transform_1(%arg0: i32, %arg1: i32) -> (i32, i32) {
    %c0_i32 = arith.constant 0 : i32
    %c0_i32_0 = arith.constant 0 : i32
    return %arg0, %c0_i32 : i32, i32
  }
  func.func @transform_2(%arg0: i32, %arg1: i32) -> (i32, i32) {
    %c0_i32 = arith.constant 0 : i32
    %c0_i32_0 = arith.constant 0 : i32
    return %c0_i32, %arg1 : i32, i32
  }
  func.func @transform_3(%arg0: i32, %arg1: i32) -> (i32, i32) {
    %c0_i32 = arith.constant 0 : i32
    %c0_i32_0 = arith.constant 0 : i32
    return %c0_i32, %arg1 : i32, i32
  }
  func.func @transform_4(%arg0: i32, %arg1: i32) -> (i32, i32) {
    %c0_i32 = arith.constant 0 : i32
    %c0_i32_0 = arith.constant 0 : i32
    return %c0_i32, %arg1 : i32, i32
  }
  func.func @transform_5(%arg0: i32, %arg1: i32) -> (i32, i32) {
    %c0_i32 = arith.constant 0 : i32
    return %arg0, %arg1 : i32, i32
  }
}

module attributes {stable_mosaic.version = 11 : i64} {
  func.func @_knn_score_kernel(%arg0: i32, %arg1: i32, %arg2: i32, %arg3: memref<1x16x128xbf16, #tpu.memory_space<vmem>>, %arg4: memref<1x16x128xbf16, #tpu.memory_space<vmem>>, %arg5: memref<1x1x16xf32, #tpu.memory_space<vmem>>, %arg6: memref<1x16x16xf32, #tpu.memory_space<vmem>>) attributes {dimension_semantics = [#tpu.dimension_semantics<parallel>, #tpu.dimension_semantics<parallel>, #tpu.dimension_semantics<parallel>], iteration_bounds = array<i64: 2, 1, 1>, scalar_prefetch = 0 : i64, scratch_operands = 0 : i64, tpu.core_type = #tpu.core_type<tc>, window_params = [{transform_indices = @transform_0, window_bounds = array<i64: 1, 16, 128>}, {transform_indices = @transform_1, window_bounds = array<i64: 1, 16, 128>}, {transform_indices = @transform_2, window_bounds = array<i64: 1, 1, 16>}, {transform_indices = @transform_3, window_bounds = array<i64: 1, 16, 16>}]} {
    %c0 = arith.constant 0 : index
    %c0_0 = arith.constant 0 : index
    %c0_1 = arith.constant 0 : index
    %0 = vector.load %arg3[%c0, %c0_0, %c0_1] : memref<1x16x128xbf16, #tpu.memory_space<vmem>>, vector<1x16x128xbf16>
    %1 = vector.shape_cast %0 : vector<1x16x128xbf16> to vector<16x128xbf16>
    %c0_2 = arith.constant 0 : index
    %c0_3 = arith.constant 0 : index
    %c0_4 = arith.constant 0 : index
    %2 = vector.load %arg4[%c0_2, %c0_3, %c0_4] : memref<1x16x128xbf16, #tpu.memory_space<vmem>>, vector<1x16x128xbf16>
    %3 = vector.shape_cast %2 : vector<1x16x128xbf16> to vector<16x128xbf16>
    %cst = arith.constant dense<0.000000e+00> : vector<16x16xf32>
    %4 = tpu.matmul %1, %3, %cst {dimension_numbers = #tpu.dot_dimension_numbers<[1], [1], [0], [0], [0, 0, 1, 0], [], []>} : vector<16x128xbf16>, vector<16x128xbf16>, vector<16x16xf32> -> vector<16x16xf32>
    %cst_5 = arith.constant 2.000000e+00 : f32
    %5 = vector.broadcast %cst_5 : f32 to vector<16x16xf32>
    %6 = arith.mulf %5, %4 : vector<16x16xf32>
    %c0_6 = arith.constant 0 : index
    %c0_7 = arith.constant 0 : index
    %c0_8 = arith.constant 0 : index
    %7 = vector.load %arg5[%c0_6, %c0_7, %c0_8] : memref<1x1x16xf32, #tpu.memory_space<vmem>>, vector<1x1x16xf32>
    %8 = vector.shape_cast %7 : vector<1x1x16xf32> to vector<1x16xf32>
    %9 = vector.broadcast %8 : vector<1x16xf32> to vector<16x16xf32>
    %10 = arith.subf %6, %9 : vector<16x16xf32>
    %c0_9 = arith.constant 0 : index
    %c0_10 = arith.constant 0 : index
    %c0_11 = arith.constant 0 : index
    %11 = vector.load %arg6[%c0_9, %c0_10, %c0_11] : memref<1x16x16xf32, #tpu.memory_space<vmem>>, vector<1x16x16xf32>
    %12 = vector.shape_cast %11 : vector<1x16x16xf32> to vector<16x16xf32>
    %13 = vector.shape_cast %10 : vector<16x16xf32> to vector<1x16x16xf32>
    tpu.vector_store %arg6[%c0_9, %c0_10, %c0_11], %13 {strides = array<i32>} : memref<1x16x16xf32, #tpu.memory_space<vmem>>, vector<1x16x16xf32>,
    return
  }
  func.func @transform_0(%arg0: i32, %arg1: i32, %arg2: i32) -> (i32, i32, i32) {
    %c0_i32 = arith.constant 0 : i32
    %c0_i32_0 = arith.constant 0 : i32
    return %arg0, %arg1, %c0_i32 : i32, i32, i32
  }
  func.func @transform_1(%arg0: i32, %arg1: i32, %arg2: i32) -> (i32, i32, i32) {
    %c0_i32 = arith.constant 0 : i32
    %c0_i32_0 = arith.constant 0 : i32
    return %arg0, %arg2, %c0_i32 : i32, i32, i32
  }
  func.func @transform_2(%arg0: i32, %arg1: i32, %arg2: i32) -> (i32, i32, i32) {
    %c0_i32 = arith.constant 0 : i32
    %c0_i32_0 = arith.constant 0 : i32
    return %arg0, %c0_i32, %arg2 : i32, i32, i32
  }
  func.func @transform_3(%arg0: i32, %arg1: i32, %arg2: i32) -> (i32, i32, i32) {
    %c0_i32 = arith.constant 0 : i32
    return %arg0, %arg1, %arg2 : i32, i32, i32
  }
}

module attributes {stable_mosaic.version = 11 : i64} {
  func.func @_edgeconv_kernel(%arg0: i32, %arg1: i32, %arg2: memref<4x32x128xbf16, #tpu.memory_space<vmem>>, %arg3: memref<32x128xbf16, #tpu.memory_space<vmem>>, %arg4: memref<128x256xbf16, #tpu.memory_space<vmem>>, %arg5: memref<128x256xbf16, #tpu.memory_space<vmem>>, %arg6: memref<1x256xf32, #tpu.memory_space<vmem>>, %arg7: memref<32x256xbf16, #tpu.memory_space<vmem>>, %arg8: memref<32x256xf32, #tpu.memory_space<vmem>>) attributes {dimension_semantics = [#tpu.dimension_semantics<parallel>, #tpu.dimension_semantics<parallel>], iteration_bounds = array<i64: 1, 1>, scalar_prefetch = 0 : i64, scratch_operands = 1 : i64, tpu.core_type = #tpu.core_type<tc>, window_params = [{transform_indices = @transform_0, window_bounds = array<i64: 4, 32, 128>}, {transform_indices = @transform_1, window_bounds = array<i64: 32, 128>}, {transform_indices = @transform_2, window_bounds = array<i64: 128, 256>}, {transform_indices = @transform_3, window_bounds = array<i64: 128, 256>}, {transform_indices = @transform_4, window_bounds = array<i64: 1, 256>}, {transform_indices = @transform_5, window_bounds = array<i64: 32, 256>}]} {
    %c0 = arith.constant 0 : index
    %c0_0 = arith.constant 0 : index
    %0 = vector.load %arg4[%c0, %c0_0] : memref<128x256xbf16, #tpu.memory_space<vmem>>, vector<128x256xbf16>
    %c0_1 = arith.constant 0 : index
    %c0_2 = arith.constant 0 : index
    %c0_3 = arith.constant 0 : index
    %1 = vector.load %arg2[%c0_1, %c0_2, %c0_3] : memref<4x32x128xbf16, #tpu.memory_space<vmem>>, vector<1x32x128xbf16>
    %2 = vector.shape_cast %1 : vector<1x32x128xbf16> to vector<32x128xbf16>
    %cst = arith.constant dense<0.000000e+00> : vector<32x256xf32>
    %3 = tpu.matmul %2, %0, %cst {dimension_numbers = #tpu.dot_dimension_numbers<[1], [0], [0], [1], [0, 0, 1, 1], [], []>} : vector<32x128xbf16>, vector<128x256xbf16>, vector<32x256xf32> -> vector<32x256xf32>
    %c0_4 = arith.constant 0 : index
    %c0_5 = arith.constant 0 : index
    %4 = vector.load %arg8[%c0_4, %c0_5] : memref<32x256xf32, #tpu.memory_space<vmem>>, vector<32x256xf32>
    tpu.vector_store %arg8[%c0_4, %c0_5], %3 {strides = array<i32>} : memref<32x256xf32, #tpu.memory_space<vmem>>, vector<32x256xf32>,
    %c1_i32 = arith.constant 1 : i32
    %5 = arith.index_cast %c1_i32 : i32 to index
    %c0_6 = arith.constant 0 : index
    %c0_7 = arith.constant 0 : index
    %6 = vector.load %arg2[%5, %c0_6, %c0_7] : memref<4x32x128xbf16, #tpu.memory_space<vmem>>, vector<1x32x128xbf16>
    %7 = vector.shape_cast %6 : vector<1x32x128xbf16> to vector<32x128xbf16>
    %cst_8 = arith.constant dense<0.000000e+00> : vector<32x256xf32>
    %8 = tpu.matmul %7, %0, %cst_8 {dimension_numbers = #tpu.dot_dimension_numbers<[1], [0], [0], [1], [0, 0, 1, 1], [], []>} : vector<32x128xbf16>, vector<128x256xbf16>, vector<32x256xf32> -> vector<32x256xf32>
    %c0_9 = arith.constant 0 : index
    %c0_10 = arith.constant 0 : index
    %9 = vector.load %arg8[%c0_9, %c0_10] : memref<32x256xf32, #tpu.memory_space<vmem>>, vector<32x256xf32>
    %10 = arith.maximumf %9, %8 : vector<32x256xf32>
    %c0_11 = arith.constant 0 : index
    %c0_12 = arith.constant 0 : index
    %11 = vector.load %arg8[%c0_11, %c0_12] : memref<32x256xf32, #tpu.memory_space<vmem>>, vector<32x256xf32>
    tpu.vector_store %arg8[%c0_11, %c0_12], %10 {strides = array<i32>} : memref<32x256xf32, #tpu.memory_space<vmem>>, vector<32x256xf32>,
    %c2_i32 = arith.constant 2 : i32
    %12 = arith.index_cast %c2_i32 : i32 to index
    %c0_13 = arith.constant 0 : index
    %c0_14 = arith.constant 0 : index
    %13 = vector.load %arg2[%12, %c0_13, %c0_14] : memref<4x32x128xbf16, #tpu.memory_space<vmem>>, vector<1x32x128xbf16>
    %14 = vector.shape_cast %13 : vector<1x32x128xbf16> to vector<32x128xbf16>
    %cst_15 = arith.constant dense<0.000000e+00> : vector<32x256xf32>
    %15 = tpu.matmul %14, %0, %cst_15 {dimension_numbers = #tpu.dot_dimension_numbers<[1], [0], [0], [1], [0, 0, 1, 1], [], []>} : vector<32x128xbf16>, vector<128x256xbf16>, vector<32x256xf32> -> vector<32x256xf32>
    %c0_16 = arith.constant 0 : index
    %c0_17 = arith.constant 0 : index
    %16 = vector.load %arg8[%c0_16, %c0_17] : memref<32x256xf32, #tpu.memory_space<vmem>>, vector<32x256xf32>
    %17 = arith.maximumf %16, %15 : vector<32x256xf32>
    %c0_18 = arith.constant 0 : index
    %c0_19 = arith.constant 0 : index
    %18 = vector.load %arg8[%c0_18, %c0_19] : memref<32x256xf32, #tpu.memory_space<vmem>>, vector<32x256xf32>
    tpu.vector_store %arg8[%c0_18, %c0_19], %17 {strides = array<i32>} : memref<32x256xf32, #tpu.memory_space<vmem>>, vector<32x256xf32>,
    %c3_i32 = arith.constant 3 : i32
    %19 = arith.index_cast %c3_i32 : i32 to index
    %c0_20 = arith.constant 0 : index
    %c0_21 = arith.constant 0 : index
    %20 = vector.load %arg2[%19, %c0_20, %c0_21] : memref<4x32x128xbf16, #tpu.memory_space<vmem>>, vector<1x32x128xbf16>
    %21 = vector.shape_cast %20 : vector<1x32x128xbf16> to vector<32x128xbf16>
    %cst_22 = arith.constant dense<0.000000e+00> : vector<32x256xf32>
    %22 = tpu.matmul %21, %0, %cst_22 {dimension_numbers = #tpu.dot_dimension_numbers<[1], [0], [0], [1], [0, 0, 1, 1], [], []>} : vector<32x128xbf16>, vector<128x256xbf16>, vector<32x256xf32> -> vector<32x256xf32>
    %c0_23 = arith.constant 0 : index
    %c0_24 = arith.constant 0 : index
    %23 = vector.load %arg8[%c0_23, %c0_24] : memref<32x256xf32, #tpu.memory_space<vmem>>, vector<32x256xf32>
    %24 = arith.maximumf %23, %22 : vector<32x256xf32>
    %c0_25 = arith.constant 0 : index
    %c0_26 = arith.constant 0 : index
    %25 = vector.load %arg8[%c0_25, %c0_26] : memref<32x256xf32, #tpu.memory_space<vmem>>, vector<32x256xf32>
    tpu.vector_store %arg8[%c0_25, %c0_26], %24 {strides = array<i32>} : memref<32x256xf32, #tpu.memory_space<vmem>>, vector<32x256xf32>,
    %c3_i32_27 = arith.constant 3 : i32
    %c0_28 = arith.constant 0 : index
    %c0_29 = arith.constant 0 : index
    %26 = vector.load %arg8[%c0_28, %c0_29] : memref<32x256xf32, #tpu.memory_space<vmem>>, vector<32x256xf32>
    %c0_30 = arith.constant 0 : index
    %c0_31 = arith.constant 0 : index
    %27 = vector.load %arg3[%c0_30, %c0_31] : memref<32x128xbf16, #tpu.memory_space<vmem>>, vector<32x128xbf16>
    %c0_32 = arith.constant 0 : index
    %c0_33 = arith.constant 0 : index
    %28 = vector.load %arg5[%c0_32, %c0_33] : memref<128x256xbf16, #tpu.memory_space<vmem>>, vector<128x256xbf16>
    %cst_34 = arith.constant dense<0.000000e+00> : vector<32x256xf32>
    %29 = tpu.matmul %27, %28, %cst_34 {dimension_numbers = #tpu.dot_dimension_numbers<[1], [0], [0], [1], [0, 0, 1, 1], [], []>} : vector<32x128xbf16>, vector<128x256xbf16>, vector<32x256xf32> -> vector<32x256xf32>
    %30 = arith.addf %26, %29 : vector<32x256xf32>
    %c0_35 = arith.constant 0 : index
    %c0_36 = arith.constant 0 : index
    %31 = vector.load %arg6[%c0_35, %c0_36] : memref<1x256xf32, #tpu.memory_space<vmem>>, vector<1x256xf32>
    %32 = vector.broadcast %31 : vector<1x256xf32> to vector<32x256xf32>
    %33 = arith.addf %30, %32 : vector<32x256xf32>
    %cst_37 = arith.constant 0.000000e+00 : f32
    %34 = vector.broadcast %cst_37 : f32 to vector<32x256xf32>
    %35 = arith.cmpf ogt, %33, %34 : vector<32x256xf32>
    %cst_38 = arith.constant 2.000000e-01 : f32
    %36 = vector.broadcast %cst_38 : f32 to vector<32x256xf32>
    %37 = arith.mulf %36, %33 : vector<32x256xf32>
    %38 = arith.select %35, %33, %37 : vector<32x256xi1>, vector<32x256xf32>
    %39 = arith.truncf %38 : vector<32x256xf32> to vector<32x256xbf16>
    %c0_39 = arith.constant 0 : index
    %c0_40 = arith.constant 0 : index
    %40 = vector.load %arg7[%c0_39, %c0_40] : memref<32x256xbf16, #tpu.memory_space<vmem>>, vector<32x256xbf16>
    tpu.vector_store %arg7[%c0_39, %c0_40], %39 {strides = array<i32>} : memref<32x256xbf16, #tpu.memory_space<vmem>>, vector<32x256xbf16>,
    return
  }
  func.func @transform_0(%arg0: i32, %arg1: i32) -> (i32, i32, i32) {
    %c0_i32 = arith.constant 0 : i32
    %c0_i32_0 = arith.constant 0 : i32
    %c0_i32_1 = arith.constant 0 : i32
    return %c0_i32, %arg0, %c0_i32_0 : i32, i32, i32
  }
  func.func @transform_1(%arg0: i32, %arg1: i32) -> (i32, i32) {
    %c0_i32 = arith.constant 0 : i32
    %c0_i32_0 = arith.constant 0 : i32
    return %arg0, %c0_i32 : i32, i32
  }
  func.func @transform_2(%arg0: i32, %arg1: i32) -> (i32, i32) {
    %c0_i32 = arith.constant 0 : i32
    %c0_i32_0 = arith.constant 0 : i32
    return %c0_i32, %arg1 : i32, i32
  }
  func.func @transform_3(%arg0: i32, %arg1: i32) -> (i32, i32) {
    %c0_i32 = arith.constant 0 : i32
    %c0_i32_0 = arith.constant 0 : i32
    return %c0_i32, %arg1 : i32, i32
  }
  func.func @transform_4(%arg0: i32, %arg1: i32) -> (i32, i32) {
    %c0_i32 = arith.constant 0 : i32
    %c0_i32_0 = arith.constant 0 : i32
    return %c0_i32, %arg1 : i32, i32
  }
  func.func @transform_5(%arg0: i32, %arg1: i32) -> (i32, i32) {
    %c0_i32 = arith.constant 0 : i32
    return %arg0, %arg1 : i32, i32
  }
}

module attributes {stable_mosaic.version = 11 : i64} {
  func.func @_pointconv4_kernel(%arg0: i32, %arg1: i32, %arg2: memref<32x64xbf16, #tpu.memory_space<vmem>>, %arg3: memref<32x64xbf16, #tpu.memory_space<vmem>>, %arg4: memref<32x128xbf16, #tpu.memory_space<vmem>>, %arg5: memref<32x256xbf16, #tpu.memory_space<vmem>>, %arg6: memref<64x128xbf16, #tpu.memory_space<vmem>>, %arg7: memref<64x128xbf16, #tpu.memory_space<vmem>>, %arg8: memref<128x128xbf16, #tpu.memory_space<vmem>>, %arg9: memref<256x128xbf16, #tpu.memory_space<vmem>>, %arg10: memref<1x128xf32, #tpu.memory_space<vmem>>, %arg11: memref<32x128xf32, #tpu.memory_space<vmem>>) attributes {dimension_semantics = [#tpu.dimension_semantics<parallel>, #tpu.dimension_semantics<parallel>], iteration_bounds = array<i64: 1, 1>, scalar_prefetch = 0 : i64, scratch_operands = 0 : i64, tpu.core_type = #tpu.core_type<tc>, window_params = [{transform_indices = @transform_0, window_bounds = array<i64: 32, 64>}, {transform_indices = @transform_1, window_bounds = array<i64: 32, 64>}, {transform_indices = @transform_2, window_bounds = array<i64: 32, 128>}, {transform_indices = @transform_3, window_bounds = array<i64: 32, 256>}, {transform_indices = @transform_4, window_bounds = array<i64: 64, 128>}, {transform_indices = @transform_5, window_bounds = array<i64: 64, 128>}, {transform_indices = @transform_6, window_bounds = array<i64: 128, 128>}, {transform_indices = @transform_7, window_bounds = array<i64: 256, 128>}, {transform_indices = @transform_8, window_bounds = array<i64: 1, 128>}, {transform_indices = @transform_9, window_bounds = array<i64: 32, 128>}]} {
    %c0 = arith.constant 0 : index
    %c0_0 = arith.constant 0 : index
    %0 = vector.load %arg2[%c0, %c0_0] : memref<32x64xbf16, #tpu.memory_space<vmem>>, vector<32x64xbf16>
    %c0_1 = arith.constant 0 : index
    %c0_2 = arith.constant 0 : index
    %1 = vector.load %arg6[%c0_1, %c0_2] : memref<64x128xbf16, #tpu.memory_space<vmem>>, vector<64x128xbf16>
    %cst = arith.constant dense<0.000000e+00> : vector<32x128xf32>
    %2 = tpu.matmul %0, %1, %cst {dimension_numbers = #tpu.dot_dimension_numbers<[1], [0], [0], [1], [0, 0, 1, 1], [], []>} : vector<32x64xbf16>, vector<64x128xbf16>, vector<32x128xf32> -> vector<32x128xf32>
    %c0_3 = arith.constant 0 : index
    %c0_4 = arith.constant 0 : index
    %3 = vector.load %arg3[%c0_3, %c0_4] : memref<32x64xbf16, #tpu.memory_space<vmem>>, vector<32x64xbf16>
    %c0_5 = arith.constant 0 : index
    %c0_6 = arith.constant 0 : index
    %4 = vector.load %arg7[%c0_5, %c0_6] : memref<64x128xbf16, #tpu.memory_space<vmem>>, vector<64x128xbf16>
    %cst_7 = arith.constant dense<0.000000e+00> : vector<32x128xf32>
    %5 = tpu.matmul %3, %4, %cst_7 {dimension_numbers = #tpu.dot_dimension_numbers<[1], [0], [0], [1], [0, 0, 1, 1], [], []>} : vector<32x64xbf16>, vector<64x128xbf16>, vector<32x128xf32> -> vector<32x128xf32>
    %6 = arith.addf %2, %5 : vector<32x128xf32>
    %c0_8 = arith.constant 0 : index
    %c0_9 = arith.constant 0 : index
    %7 = vector.load %arg4[%c0_8, %c0_9] : memref<32x128xbf16, #tpu.memory_space<vmem>>, vector<32x128xbf16>
    %c0_10 = arith.constant 0 : index
    %c0_11 = arith.constant 0 : index
    %8 = vector.load %arg8[%c0_10, %c0_11] : memref<128x128xbf16, #tpu.memory_space<vmem>>, vector<128x128xbf16>
    %cst_12 = arith.constant dense<0.000000e+00> : vector<32x128xf32>
    %9 = tpu.matmul %7, %8, %cst_12 {dimension_numbers = #tpu.dot_dimension_numbers<[1], [0], [0], [1], [0, 0, 1, 1], [], []>} : vector<32x128xbf16>, vector<128x128xbf16>, vector<32x128xf32> -> vector<32x128xf32>
    %10 = arith.addf %6, %9 : vector<32x128xf32>
    %c0_13 = arith.constant 0 : index
    %c0_14 = arith.constant 0 : index
    %11 = vector.load %arg5[%c0_13, %c0_14] : memref<32x256xbf16, #tpu.memory_space<vmem>>, vector<32x256xbf16>
    %c0_15 = arith.constant 0 : index
    %c0_16 = arith.constant 0 : index
    %12 = vector.load %arg9[%c0_15, %c0_16] : memref<256x128xbf16, #tpu.memory_space<vmem>>, vector<256x128xbf16>
    %cst_17 = arith.constant dense<0.000000e+00> : vector<32x128xf32>
    %13 = tpu.matmul %11, %12, %cst_17 {dimension_numbers = #tpu.dot_dimension_numbers<[1], [0], [0], [1], [0, 0, 1, 1], [], []>} : vector<32x256xbf16>, vector<256x128xbf16>, vector<32x128xf32> -> vector<32x128xf32>
    %14 = arith.addf %10, %13 : vector<32x128xf32>
    %c0_18 = arith.constant 0 : index
    %c0_19 = arith.constant 0 : index
    %15 = vector.load %arg10[%c0_18, %c0_19] : memref<1x128xf32, #tpu.memory_space<vmem>>, vector<1x128xf32>
    %16 = vector.broadcast %15 : vector<1x128xf32> to vector<32x128xf32>
    %17 = arith.addf %14, %16 : vector<32x128xf32>
    %cst_20 = arith.constant 0.000000e+00 : f32
    %18 = vector.broadcast %cst_20 : f32 to vector<32x128xf32>
    %19 = arith.cmpf ogt, %17, %18 : vector<32x128xf32>
    %cst_21 = arith.constant 2.000000e-01 : f32
    %20 = vector.broadcast %cst_21 : f32 to vector<32x128xf32>
    %21 = arith.mulf %20, %17 : vector<32x128xf32>
    %22 = arith.select %19, %17, %21 : vector<32x128xi1>, vector<32x128xf32>
    %c0_22 = arith.constant 0 : index
    %c0_23 = arith.constant 0 : index
    %23 = vector.load %arg11[%c0_22, %c0_23] : memref<32x128xf32, #tpu.memory_space<vmem>>, vector<32x128xf32>
    tpu.vector_store %arg11[%c0_22, %c0_23], %22 {strides = array<i32>} : memref<32x128xf32, #tpu.memory_space<vmem>>, vector<32x128xf32>,
    return
  }
  func.func @transform_0(%arg0: i32, %arg1: i32) -> (i32, i32) {
    %c0_i32 = arith.constant 0 : i32
    %c0_i32_0 = arith.constant 0 : i32
    return %arg0, %c0_i32 : i32, i32
  }
  func.func @transform_1(%arg0: i32, %arg1: i32) -> (i32, i32) {
    %c0_i32 = arith.constant 0 : i32
    %c0_i32_0 = arith.constant 0 : i32
    return %arg0, %c0_i32 : i32, i32
  }
  func.func @transform_2(%arg0: i32, %arg1: i32) -> (i32, i32) {
    %c0_i32 = arith.constant 0 : i32
    %c0_i32_0 = arith.constant 0 : i32
    return %arg0, %c0_i32 : i32, i32
  }
  func.func @transform_3(%arg0: i32, %arg1: i32) -> (i32, i32) {
    %c0_i32 = arith.constant 0 : i32
    %c0_i32_0 = arith.constant 0 : i32
    return %arg0, %c0_i32 : i32, i32
  }
  func.func @transform_4(%arg0: i32, %arg1: i32) -> (i32, i32) {
    %c0_i32 = arith.constant 0 : i32
    %c0_i32_0 = arith.constant 0 : i32
    return %c0_i32, %arg1 : i32, i32
  }
  func.func @transform_5(%arg0: i32, %arg1: i32) -> (i32, i32) {
    %c0_i32 = arith.constant 0 : i32
    %c0_i32_0 = arith.constant 0 : i32
    return %c0_i32, %arg1 : i32, i32
  }
  func.func @transform_6(%arg0: i32, %arg1: i32) -> (i32, i32) {
    %c0_i32 = arith.constant 0 : i32
    %c0_i32_0 = arith.constant 0 : i32
    return %c0_i32, %arg1 : i32, i32
  }
  func.func @transform_7(%arg0: i32, %arg1: i32) -> (i32, i32) {
    %c0_i32 = arith.constant 0 : i32
    %c0_i32_0 = arith.constant 0 : i32
    return %c0_i32, %arg1 : i32, i32
  }
  func.func @transform_8(%arg0: i32, %arg1: i32) -> (i32, i32) {
    %c0_i32 = arith.constant 0 : i32
    %c0_i32_0 = arith.constant 0 : i32
    return %c0_i32, %arg1 : i32, i32
  }
  func.func @transform_9(%arg0: i32, %arg1: i32) -> (i32, i32) {
    %c0_i32 = arith.constant 0 : i32
    return %arg0, %arg1 : i32, i32
  }
}

</mosaic_0001>

<bundles_post_ra>
// kernel: approx_top_k.52
= control target key start
LH: loop header
LB: loop body
LE: loop exit
PB: predicated region body
PF: predicated region fallthrough
CT: control target
= control target key end

     0   :  { %5 = vsyncpa [#allocation2], 0  ;;  %s1337_s0 = inlined_call_operand.vmem [shape: f32[2,16,16], index: 0, kind: input, shape index: {}]   ;;  %s1338_s1 = inlined_call_operand.vmem [shape: s32[2,16,16], index: 1, kind: input, shape index: {}]   ;;  %s1339_s2 = inlined_call_operand.hbm [shape: f32[2,16,16], index: 2, kind: output, shape index: {0}]   ;;  %s1340_s3 = inlined_call_operand.vmem [shape: s32[2,16,16], index: 3, kind: output, shape index: {1}]  }
   0x1   :  { %7 = vsyncpa [#allocation2 + $0x1], 0  ;;  %s1094_s12 = smov 0   ;;  %s1096_s13 = smov 0  }
   0x2   :  { %s1098_s14 = smov 0  }
   0x3 LB: > { %s897_s15 = sadd.s32 4294967295, %s1070_s14   ;;  %s898_s16 = sadd.s32 4294967294, %s1070_s14   ;;  %s1070_s14 = sphi %s1098_s14, %s13_s14   ;;  %s1066_s13 = sphi %s1096_s13, %s1348_s13   ;;  %s1062_s12 = sphi %s1094_s12, %s1347_s12  }
   0x4   : > { %s32_s17 = sadd.s32 1, %s1066_s13  ;;  %p900_p1 = scmp.ge.s32.totalorder %s1070_s14, 2 }
   0x5   : > { %p34_p0 = scmp.ge.s32.totalorder %s32_s17, 2  ;;  %s48_s18 = sand.u32 (!%p900_p1), 1, %s1070_s14  }
   0x6   : > { %46 = sbr.rel (%p900_p1) target bundleno = 16 (0x10), region = 16  ;;  %s987_s19 = sshll.u32 (!%p900_p1), %s1066_s13, 4 }
   0x7   : > { %s1350_s17 = smov (%p34_p0, %s32_s17), 0  ;;  %s901_s20 = sshll.u32 (!%p900_p1), %s48_s18, 4 }
   0x8   : > { %s56_s23 = scalar_lea.vmem (!%p900_p1), %s1337_s0, %s987_s19  ;;  %s50_s24 = scalar_lea.vmem (!%p900_p1), [#allocation0], %s901_s20 }
   0x9   : > { %s103_s27 = scalar_lea.vmem (!%p900_p1), %s1338_s1, %s987_s19  ;;  %s97_s28 = scalar_lea.vmem (!%p900_p1), [#allocation3], %s901_s20 }
   0xb   : > { %v87_v0 = vld [vmem:[%s56_s23] sm:$0xff]  ;;  %v89_v1 = vld [vmem:[%s56_s23 + $0x8] sm:$0xff] }
   0xc   : > { %88 = vst [vmem:[%s50_s24] sm:$0xff] %v87_v0  ;;  %v134_v2 = vld [vmem:[%s103_s27] sm:$0xff]  ;;  %v136_v3 = vld [vmem:[%s103_s27 + $0x8] sm:$0xff] }
   0xd   : > { %90 = vst [vmem:[%s50_s24 + $0x8] sm:$0xff] %v89_v1 }
   0xe   : > { %135 = vst [vmem:[%s97_s28] sm:$0xff] %v134_v2 }
   0xf   : > { %137 = vst [vmem:[%s97_s28 + $0x8] sm:$0xff] %v136_v3 }
  0x10 PF: > { %p907_p2 = scmp.ge.s32.totalorder %s1070_s14, 1  ;;  %p142_p3 = scmp.lt.s32.totalorder %s1070_s14, 3 }
  0x12   : > { %p143_p4 = pnand %p907_p2, %p142_p3 }
  0x13   : > { %s1127_s29 = sand.u32 (!%p143_p4), 1, %s897_s15   ;;  %s989_s8 = sshll.u32 (!%p143_p4), %s1062_s12, 4 }
  0x14   : > { %146 = sbr.rel (%p143_p4) target bundleno = 142 (0x8e), region = 88  ;;  %s1130_s30 = sshll.u32 (!%p143_p4), %s1127_s29, 4 }
  0x15   : > { %s151_s4 = scalar_lea.vmem (!%p143_p4), [#allocation0], %s1130_s30  ;;  %s155_s5 = scalar_lea.vmem (!%p143_p4), [#allocation3], %s1130_s30 }
  0x16   : > { %s1146_s6 = scalar_lea.vmem (!%p143_p4), [#allocation1], %s1130_s30  ;;  %s1152_s7 = scalar_lea.vmem (!%p143_p4), [#allocation4], %s1130_s30 }
  0x17   : > { %s743_s11 = scalar_lea.hbm (!%p143_p4), %s1339_s2, %s989_s8  ;;  %s744_s15 = sshll.u32 (!%p143_p4), %s1146_s6, 4  ;;  %s745_s15 = int_to_ptr.vmem [resolvable:$true] %s744_s15 }
  0x18   : > { %s746_s18 = sshll.u32 (!%p143_p4), %s743_s11, 4  ;;  %s758_s20 = scalar_lea.vmem (!%p143_p4), %s1340_s3, %s989_s8  ;;  %s747_s18 = int_to_ptr.hbm [resolvable:$true] %s746_s18 }
  0x19   : > { %v178_v4 = vlaneseq  ;;  %v182_v6 = vld [vmem:[%s151_s4] sm:$0xff]  ;;  %v913_v11 = vld [vmem:[%s151_s4 + $0x8] sm:$0xff]  ;;  %s728_s21 = scalar_lea.sflag [#allocation2], %s1127_s29  ;;  %s1032_s22 = sshra.s32 %s747_s18, 4  ;;  %s1033_s22 = int_to_ptr.hbm [resolvable:$true] %s1032_s22 }
  0x1a   : > { %v183_v7 = vld.sshfl [vmem:[%s151_s4] sm:$0xff pattern:$0x67452301]  ;;  %v914_v16 = vld.sshfl [vmem:[%s151_s4 + $0x8] sm:$0xff pattern:$0x67452301]  ;;  %p1037_p6 = scmp.lt.s32.totalorder %s1033_s22, %s1339_s2 }
  0x1b   : > { %v1132_v5 = vshrl.u32 %v178_v4, 7  ;;  %v184_v9 = vld [vmem:[%s155_s5] sm:$0xff]  ;;  %vm188_vm0 = vcmp.gt.f32.partialorder %v183_v7, %v182_v6  ;;  %vm193_vm1 = vcmp.gt.f32.partialorder %v182_v6, %v183_v7  ;;  %v915_v17 = vld [vmem:[%s155_s5 + $0x8] sm:$0xff]  ;;  %vm215_vm3 = vcmp.gt.f32.partialorder %v914_v16, %v913_v11  ;;  %s1034_s23 = scalar_lea.hbm %s1033_s22, 16  ;;  %s1036_s26 = scalar_lea.hbm %s1339_s2, 32 }
  0x1c   : > { %v185_v10 = vld.sshfl [vmem:[%s155_s5] sm:$0xff pattern:$0x67452301]  ;;  %v198_v12 = vsel %vm188_vm0, %v183_v7, %v182_v6  ;;  %v199_v13 = vsel %vm193_vm1, %v183_v7, %v182_v6  ;;  %v916_v19 = vld.sshfl [vmem:[%s155_s5 + $0x8] sm:$0xff pattern:$0x67452301]  ;;  %vm220_vm4 = vcmp.gt.f32.partialorder %v913_v11, %v914_v16  ;;  %v225_v22 = vsel %vm215_vm3, %v914_v16, %v913_v11  ;;  %p1035_p5 = scmp.ne.s32.totalorder %s1033_s22, %s1034_s23  ;;  %p1038_p7 = scmp.lt.s32.totalorder %s1036_s26, %s1034_s23 }
  0x1d   : > { %v180_v8 = vand.u32 1, %v1132_v5  ;;  %v202_v14 = vsel %vm188_vm0, %v185_v10, %v184_v9  ;;  %v203_v15 = vsel %vm193_vm1, %v185_v10, %v184_v9  ;;  %v226_v23 = vsel %vm220_vm4, %v914_v16, %v913_v11 }
  0x1e   : > { %v230_v25 = vsel %vm215_vm3, %v916_v19, %v915_v17  ;;  %v231_v26 = vsel %vm220_vm4, %v916_v19, %v915_v17  ;;  %v238_v28 = vand.u32 2, %v1132_v5  ;;  %v354_v62 = vand.u32 4, %v1132_v5  ;;  %p1039_p8 = por %p1038_p7, %p1037_p6 }
  0x1f   : > { %vm1137_vm2 = vcmp.eq.s32.totalorder %v180_v8, 0 }
  0x20   : > { %v200_v20 = vsel %vm1137_vm2, %v198_v12, %v199_v13  ;;  %v204_v21 = vsel %vm1137_vm2, %v202_v14, %v203_v15  ;;  %v227_v24 = vsel %vm1137_vm2, %v225_v22, %v226_v23  ;;  %v232_v27 = vsel %vm1137_vm2, %v230_v25, %v231_v26  ;;  %p1040_p9 = pnand %p1039_p8, %p1035_p5 }
  0x21   : > { %201 = vst [vmem:[%s1146_s6] sm:$0xff] %v200_v20  ;;  %vm1161_vm5 = vcmp.eq.s32.totalorder %v238_v28, 0  ;;  %vm1198_vm14 = vcmp.eq.s32.totalorder %v354_v62, 0 }
  0x22   : > { %205 = vst [vmem:[%s1152_s7] sm:$0xff] %v204_v21 }
  0x23   : > { %917 = vst [vmem:[%s1146_s6 + $0x8] sm:$0xff] %v227_v24 }
  0x24   : > { %918 = vst [vmem:[%s1152_s7 + $0x8] sm:$0xff] %v232_v27 }
  0x28   : > { %v241_v29 = vld.sshfl [vmem:[%s1146_s6] sm:$0xff pattern:$0x45670123] }
  0x29   : > { %v243_v31 = vld.sshfl [vmem:[%s1152_s7] sm:$0xff pattern:$0x45670123]  ;;  %vm246_vm6 = vcmp.gt.f32.partialorder %v241_v29, %v200_v20  ;;  %vm251_vm7 = vcmp.gt.f32.partialorder %v200_v20, %v241_v29 }
  0x2a   : > { %v256_v32 = vsel %vm246_vm6, %v241_v29, %v200_v20  ;;  %v257_v33 = vsel %vm251_vm7, %v241_v29, %v200_v20  ;;  %v260_v34 = vsel %vm246_vm6, %v243_v31, %v204_v21  ;;  %v261_v35 = vsel %vm251_vm7, %v243_v31, %v204_v21  ;;  %v921_v36 = vld.sshfl [vmem:[%s1146_s6 + $0x8] sm:$0xff pattern:$0x45670123] }
  0x2b   : > { %v258_v37 = vsel %vm1161_vm5, %v256_v32, %v257_v33  ;;  %v262_v38 = vsel %vm1161_vm5, %v260_v34, %v261_v35  ;;  %v923_v39 = vld.sshfl [vmem:[%s1152_s7 + $0x8] sm:$0xff pattern:$0x45670123]  ;;  %vm273_vm8 = vcmp.gt.f32.partialorder %v921_v36, %v227_v24  ;;  %vm278_vm9 = vcmp.gt.f32.partialorder %v227_v24, %v921_v36 }
  0x2c   : > { %259 = vst [vmem:[%s1146_s6] sm:$0xff] %v258_v37  ;;  %v283_v40 = vsel %vm273_vm8, %v921_v36, %v227_v24  ;;  %v284_v41 = vsel %vm278_vm9, %v921_v36, %v227_v24  ;;  %v288_v42 = vsel %vm273_vm8, %v923_v39, %v232_v27  ;;  %v289_v43 = vsel %vm278_vm9, %v923_v39, %v232_v27 }
  0x2d   : > { %263 = vst [vmem:[%s1152_s7] sm:$0xff] %v262_v38  ;;  %v285_v44 = vsel %vm1161_vm5, %v283_v40, %v284_v41  ;;  %v290_v45 = vsel %vm1161_vm5, %v288_v42, %v289_v43 }
  0x2e   : > { %924 = vst [vmem:[%s1146_s6 + $0x8] sm:$0xff] %v285_v44 }
  0x2f   : > { %925 = vst [vmem:[%s1152_s7 + $0x8] sm:$0xff] %v290_v45 }
  0x33   : > { %v299_v46 = vld.sshfl [vmem:[%s1146_s6] sm:$0xff pattern:$0x67452301] }
  0x34   : > { %v301_v47 = vld.sshfl [vmem:[%s1152_s7] sm:$0xff pattern:$0x67452301]  ;;  %vm304_vm10 = vcmp.gt.f32.partialorder %v299_v46, %v258_v37  ;;  %vm309_vm11 = vcmp.gt.f32.partialorder %v258_v37, %v299_v46 }
  0x35   : > { %v314_v48 = vsel %vm304_vm10, %v299_v46, %v258_v37  ;;  %v315_v49 = vsel %vm309_vm11, %v299_v46, %v258_v37  ;;  %v318_v50 = vsel %vm304_vm10, %v301_v47, %v262_v38  ;;  %v319_v51 = vsel %vm309_vm11, %v301_v47, %v262_v38  ;;  %v928_v52 = vld.sshfl [vmem:[%s1146_s6 + $0x8] sm:$0xff pattern:$0x67452301] }
  0x36   : > { %v316_v53 = vsel %vm1137_vm2, %v314_v48, %v315_v49  ;;  %v320_v54 = vsel %vm1137_vm2, %v318_v50, %v319_v51  ;;  %v930_v55 = vld.sshfl [vmem:[%s1152_s7 + $0x8] sm:$0xff pattern:$0x67452301]  ;;  %vm331_vm12 = vcmp.gt.f32.partialorder %v928_v52, %v285_v44  ;;  %vm336_vm13 = vcmp.gt.f32.partialorder %v285_v44, %v928_v52 }
  0x37   : > { %317 = vst [vmem:[%s1146_s6] sm:$0xff] %v316_v53  ;;  %v341_v56 = vsel %vm331_vm12, %v928_v52, %v285_v44  ;;  %v342_v57 = vsel %vm336_vm13, %v928_v52, %v285_v44  ;;  %v346_v58 = vsel %vm331_vm12, %v930_v55, %v290_v45  ;;  %v347_v59 = vsel %vm336_vm13, %v930_v55, %v290_v45 }
  0x38   : > { %321 = vst [vmem:[%s1152_s7] sm:$0xff] %v320_v54  ;;  %v343_v60 = vsel %vm1137_vm2, %v341_v56, %v342_v57  ;;  %v348_v61 = vsel %vm1137_vm2, %v346_v58, %v347_v59 }
  0x39   : > { %931 = vst [vmem:[%s1146_s6 + $0x8] sm:$0xff] %v343_v60 }
  0x3a   : > { %932 = vst [vmem:[%s1152_s7 + $0x8] sm:$0xff] %v348_v61 }
  0x3e   : > { %v357_v63 = vld.sshfl [vmem:[%s1146_s6] sm:$0xff pattern:$0x1234567] }
  0x3f   : > { %v359_v1 = vld.sshfl [vmem:[%s1152_s7] sm:$0xff pattern:$0x1234567]  ;;  %vm362_vm15 = vcmp.gt.f32.partialorder %v357_v63, %v316_v53  ;;  %vm367_vm0 = vcmp.gt.f32.partialorder %v316_v53, %v357_v63 }
  0x40   : > { %v372_v2 = vsel %vm362_vm15, %v357_v63, %v316_v53  ;;  %v373_v3 = vsel %vm367_vm0, %v357_v63, %v316_v53  ;;  %v376_v4 = vsel %vm362_vm15, %v359_v1, %v320_v54  ;;  %v377_v5 = vsel %vm367_vm0, %v359_v1, %v320_v54  ;;  %v935_v6 = vld.sshfl [vmem:[%s1146_s6 + $0x8] sm:$0xff pattern:$0x1234567] }
  0x41   : > { %v374_v7 = vsel %vm1198_vm14, %v372_v2, %v373_v3  ;;  %v378_v8 = vsel %vm1198_vm14, %v376_v4, %v377_v5  ;;  %v937_v9 = vld.sshfl [vmem:[%s1152_s7 + $0x8] sm:$0xff pattern:$0x1234567]  ;;  %vm389_vm1 = vcmp.gt.f32.partialorder %v935_v6, %v343_v60  ;;  %vm394_vm3 = vcmp.gt.f32.partialorder %v343_v60, %v935_v6 }
  0x42   : > { %375 = vst [vmem:[%s1146_s6] sm:$0xff] %v374_v7  ;;  %v399_v10 = vsel %vm389_vm1, %v935_v6, %v343_v60  ;;  %v400_v11 = vsel %vm394_vm3, %v935_v6, %v343_v60  ;;  %v404_v12 = vsel %vm389_vm1, %v937_v9, %v348_v61  ;;  %v405_v13 = vsel %vm394_vm3, %v937_v9, %v348_v61 }
  0x43   : > { %379 = vst [vmem:[%s1152_s7] sm:$0xff] %v378_v8  ;;  %v401_v14 = vsel %vm1198_vm14, %v399_v10, %v400_v11  ;;  %v406_v15 = vsel %vm1198_vm14, %v404_v12, %v405_v13 }
  0x44   : > { %938 = vst [vmem:[%s1146_s6 + $0x8] sm:$0xff] %v401_v14 }
  0x45   : > { %939 = vst [vmem:[%s1152_s7 + $0x8] sm:$0xff] %v406_v15 }
  0x49   : > { %v415_v16 = vld.sshfl [vmem:[%s1146_s6] sm:$0xff pattern:$0x54761032] }
  0x4a   : > { %v417_v17 = vld.sshfl [vmem:[%s1152_s7] sm:$0xff pattern:$0x54761032]  ;;  %vm420_vm4 = vcmp.gt.f32.partialorder %v415_v16, %v374_v7  ;;  %vm425_vm6 = vcmp.gt.f32.partialorder %v374_v7, %v415_v16 }
  0x4b   : > { %v430_v19 = vsel %vm420_vm4, %v415_v16, %v374_v7  ;;  %v431_v20 = vsel %vm425_vm6, %v415_v16, %v374_v7  ;;  %v434_v21 = vsel %vm420_vm4, %v417_v17, %v378_v8  ;;  %v435_v22 = vsel %vm425_vm6, %v417_v17, %v378_v8  ;;  %v942_v23 = vld.sshfl [vmem:[%s1146_s6 + $0x8] sm:$0xff pattern:$0x54761032] }
  0x4c   : > { %v432_v24 = vsel %vm1161_vm5, %v430_v19, %v431_v20  ;;  %v436_v25 = vsel %vm1161_vm5, %v434_v21, %v435_v22  ;;  %v944_v26 = vld.sshfl [vmem:[%s1152_s7 + $0x8] sm:$0xff pattern:$0x54761032]  ;;  %vm447_vm7 = vcmp.gt.f32.partialorder %v942_v23, %v401_v14  ;;  %vm452_vm8 = vcmp.gt.f32.partialorder %v401_v14, %v942_v23 }
  0x4d   : > { %433 = vst [vmem:[%s1146_s6] sm:$0xff] %v432_v24  ;;  %v457_v27 = vsel %vm447_vm7, %v942_v23, %v401_v14  ;;  %v458_v28 = vsel %vm452_vm8, %v942_v23, %v401_v14  ;;  %v462_v29 = vsel %vm447_vm7, %v944_v26, %v406_v15  ;;  %v463_v31 = vsel %vm452_vm8, %v944_v26, %v406_v15 }
  0x4e   : > { %437 = vst [vmem:[%s1152_s7] sm:$0xff] %v436_v25  ;;  %v459_v32 = vsel %vm1161_vm5, %v457_v27, %v458_v28  ;;  %v464_v33 = vsel %vm1161_vm5, %v462_v29, %v463_v31 }
  0x4f   : > { %945 = vst [vmem:[%s1146_s6 + $0x8] sm:$0xff] %v459_v32 }
  0x50   : > { %946 = vst [vmem:[%s1152_s7 + $0x8] sm:$0xff] %v464_v33 }
  0x54   : > { %v473_v34 = vld.sshfl [vmem:[%s1146_s6] sm:$0xff pattern:$0x67452301] }
  0x55   : > { %vm478_vm11 = vcmp.gt.f32.partialorder %v473_v34, %v432_v24  ;;  %vm483_vm12 = vcmp.gt.f32.partialorder %v432_v24, %v473_v34  ;;  %v475_v43 = vld.sshfl [vmem:[%s1152_s7] sm:$0xff pattern:$0x67452301] }
  0x56   : > { %v949_v35 = vld.sshfl [vmem:[%s1146_s6 + $0x8] sm:$0xff pattern:$0x67452301]  ;;  %v488_v44 = vsel %vm478_vm11, %v473_v34, %v432_v24  ;;  %v489_v45 = vsel %vm483_vm12, %v473_v34, %v432_v24  ;;  %v492_v46 = vsel %vm478_vm11, %v475_v43, %v436_v25  ;;  %v493_v47 = vsel %vm483_vm12, %v475_v43, %v436_v25 }
  0x57   : > { %v951_v36 = vld.sshfl [vmem:[%s1152_s7 + $0x8] sm:$0xff pattern:$0x67452301]  ;;  %vm505_vm9 = vcmp.gt.f32.partialorder %v949_v35, %v459_v32  ;;  %vm510_vm10 = vcmp.gt.f32.partialorder %v459_v32, %v949_v35  ;;  %v490_v48 = vsel %vm1137_vm2, %v488_v44, %v489_v45  ;;  %v494_v49 = vsel %vm1137_vm2, %v492_v46, %v493_v47 }
  0x58   : > { %v515_v37 = vsel %vm505_vm9, %v949_v35, %v459_v32  ;;  %v516_v38 = vsel %vm510_vm10, %v949_v35, %v459_v32  ;;  %v520_v39 = vsel %vm505_vm9, %v951_v36, %v464_v33  ;;  %v521_v40 = vsel %vm510_vm10, %v951_v36, %v464_v33 }
  0x59   : > { %v517_v41 = vsel %vm1137_vm2, %v515_v37, %v516_v38  ;;  %v522_v42 = vsel %vm1137_vm2, %v520_v39, %v521_v40 }
  0x5a   : > { %952 = vst [vmem:[%s1146_s6 + $0x8] sm:$0xff] %v517_v41 }
  0x5b   : > { %953 = vst [vmem:[%s1152_s7 + $0x8] sm:$0xff] %v522_v42 }
  0x61   : > { %v954_v50 = vld [vmem:[%s1146_s6 + $0xf] ss:$-1 sm:$0xff] }
  0x62   : > { %v955_v51 = vld [vmem:[%s1152_s7 + $0xf] ss:$-1 sm:$0xff]  ;;  %vm538_vm13 = vcmp.gt.f32.partialorder %v954_v50, %v490_v48 }
  0x63   : > { %v543_v52 = vsel %vm538_vm13, %v954_v50, %v490_v48  ;;  %v544_v53 = vsel %vm538_vm13, %v490_v48, %v954_v50  ;;  %v548_v54 = vsel %vm538_vm13, %v955_v51, %v494_v49  ;;  %v549_v55 = vsel %vm538_vm13, %v494_v49, %v955_v51 }
  0x64   : > { %545 = vst [vmem:[%s1146_s6] sm:$0xff] %v543_v52 }
  0x65   : > { %956 = vst [vmem:[%s1146_s6 + $0xf] ss:$-1 sm:$0xff] %v544_v53 }
  0x66   : > { %550 = vst [vmem:[%s1152_s7] sm:$0xff] %v548_v54 }
  0x67   : > { %957 = vst [vmem:[%s1152_s7 + $0xf] ss:$-1 sm:$0xff] %v549_v55 }
  0x6b   : > { %v559_v56 = vld.sshfl [vmem:[%s1146_s6] sm:$0xff pattern:$0x32107654] }
  0x6c   : > { %vm564_vm15 = vcmp.gt.f32.partialorder %v559_v56, %v543_v52  ;;  %vm569_vm0 = vcmp.gt.f32.partialorder %v543_v52, %v559_v56  ;;  %v959_v57 = vld [vmem:[%s1146_s6 + $0x8] sm:$0xff] }
  0x6d   : > { %v960_v58 = vld.sshfl [vmem:[%s1146_s6 + $0x8] sm:$0xff pattern:$0x32107654]  ;;  %v561_v59 = vld.sshfl [vmem:[%s1152_s7] sm:$0xff pattern:$0x32107654]  ;;  %v574_v60 = vsel %vm564_vm15, %v559_v56, %v543_v52  ;;  %v575_v61 = vsel %vm569_vm0, %v559_v56, %v543_v52 }
  0x6e   : > { %vm591_vm1 = vcmp.gt.f32.partialorder %v960_v58, %v959_v57  ;;  %vm596_vm3 = vcmp.gt.f32.partialorder %v959_v57, %v960_v58  ;;  %v576_v62 = vsel %vm1198_vm14, %v574_v60, %v575_v61  ;;  %v578_v63 = vsel %vm564_vm15, %v561_v59, %v548_v54  ;;  %v961_v2 = vld [vmem:[%s1152_s7 + $0x8] sm:$0xff] }
  0x6f   : > { %v579_v1 = vsel %vm569_vm0, %v561_v59, %v548_v54  ;;  %v962_v3 = vld.sshfl [vmem:[%s1152_s7 + $0x8] sm:$0xff pattern:$0x32107654]  ;;  %v601_v4 = vsel %vm591_vm1, %v960_v58, %v959_v57  ;;  %577 = vst [vmem:[%s1146_s6] sm:$0xff] %v576_v62  ;;  %v602_v6 = vsel %vm596_vm3, %v960_v58, %v959_v57 }
  0x70   : > { %v580_v5 = vsel %vm1198_vm14, %v578_v63, %v579_v1  ;;  %v606_v7 = vsel %vm591_vm1, %v962_v3, %v961_v2  ;;  %v607_v8 = vsel %vm596_vm3, %v962_v3, %v961_v2  ;;  %v603_v9 = vsel %vm1198_vm14, %v601_v4, %v602_v6 }
  0x71   : > { %581 = vst [vmem:[%s1152_s7] sm:$0xff] %v580_v5  ;;  %v608_v0 = vsel %vm1198_vm14, %v606_v7, %v607_v8 }
  0x72   : > { %963 = vst [vmem:[%s1146_s6 + $0x8] sm:$0xff] %v603_v9 }
  0x73   : > { %964 = vst [vmem:[%s1152_s7 + $0x8] sm:$0xff] %v608_v0 }
  0x76   : > { %v617_v10 = vld.sshfl [vmem:[%s1146_s6] sm:$0xff pattern:$0x54761032] }
  0x77   : > { %vm622_vm14 = vcmp.gt.f32.partialorder %v617_v10, %v576_v62  ;;  %vm627_vm4 = vcmp.gt.f32.partialorder %v576_v62, %v617_v10 }
  0x78   : > { %v619_v11 = vld.sshfl [vmem:[%s1152_s7] sm:$0xff pattern:$0x54761032]  ;;  %v632_v12 = vsel %vm622_vm14, %v617_v10, %v576_v62  ;;  %v633_v13 = vsel %vm627_vm4, %v617_v10, %v576_v62 }
  0x79   : > { %v636_v14 = vsel %vm622_vm14, %v619_v11, %v580_v5  ;;  %v637_v15 = vsel %vm627_vm4, %v619_v11, %v580_v5  ;;  %v967_v16 = vld.sshfl [vmem:[%s1146_s6 + $0x8] sm:$0xff pattern:$0x54761032]  ;;  %v634_v17 = vsel %vm1161_vm5, %v632_v12, %v633_v13 }
  0x7a   : > { %v638_v19 = vsel %vm1161_vm5, %v636_v14, %v637_v15  ;;  %v969_v20 = vld.sshfl [vmem:[%s1152_s7 + $0x8] sm:$0xff pattern:$0x54761032]  ;;  %vm649_vm6 = vcmp.gt.f32.partialorder %v967_v16, %v603_v9  ;;  %vm654_vm7 = vcmp.gt.f32.partialorder %v603_v9, %v967_v16  ;;  %635 = vst [vmem:[%s1146_s6] sm:$0xff] %v634_v17 }
  0x7b   : > { %v659_v21 = vsel %vm649_vm6, %v967_v16, %v603_v9  ;;  %v660_v22 = vsel %vm654_vm7, %v967_v16, %v603_v9  ;;  %v664_v23 = vsel %vm649_vm6, %v969_v20, %v608_v0  ;;  %v665_v24 = vsel %vm654_vm7, %v969_v20, %v608_v0  ;;  %639 = vst [vmem:[%s1152_s7] sm:$0xff] %v638_v19 }
  0x7c   : > { %v661_v25 = vsel %vm1161_vm5, %v659_v21, %v660_v22  ;;  %v666_v30 = vsel %vm1161_vm5, %v664_v23, %v665_v24 }
  0x7d   : > { %970 = vst [vmem:[%s1146_s6 + $0x8] sm:$0xff] %v661_v25 }
  0x7e   : > { %971 = vst [vmem:[%s1152_s7 + $0x8] sm:$0xff] %v666_v30 }
  0x81   : > { %v675_v26 = vld.sshfl [vmem:[%s1146_s6] sm:$0xff pattern:$0x67452301] }
  0x82   : > { %v677_v27 = vld.sshfl [vmem:[%s1152_s7] sm:$0xff pattern:$0x67452301]  ;;  %vm680_vm5 = vcmp.gt.f32.partialorder %v675_v26, %v634_v17  ;;  %vm685_vm8 = vcmp.gt.f32.partialorder %v634_v17, %v675_v26 }
  0x83   : > { %v690_v28 = vsel %vm680_vm5, %v675_v26, %v634_v17  ;;  %v691_v29 = vsel %vm685_vm8, %v675_v26, %v634_v17  ;;  %v694_v31 = vsel %vm680_vm5, %v677_v27, %v638_v19  ;;  %v695_v32 = vsel %vm685_vm8, %v677_v27, %v638_v19 }
  0x84   : > { %v974_v33 = vld.sshfl [vmem:[%s1146_s6 + $0x8] sm:$0xff pattern:$0x67452301]  ;;  %v692_v34 = vsel %vm1137_vm2, %v690_v28, %v691_v29  ;;  %v696_v35 = vsel %vm1137_vm2, %v694_v31, %v695_v32 }
  0x85   : > { %v976_v36 = vld.sshfl [vmem:[%s1152_s7 + $0x8] sm:$0xff pattern:$0x67452301]  ;;  %vm707_vm9 = vcmp.gt.f32.partialorder %v974_v33, %v661_v25  ;;  %vm712_vm10 = vcmp.gt.f32.partialorder %v661_v25, %v974_v33  ;;  %693 = vst [vmem:[%s1146_s6] sm:$0xff] %v692_v34 }
  0x86   : > { %v717_v37 = vsel %vm707_vm9, %v974_v33, %v661_v25  ;;  %v718_v38 = vsel %vm712_vm10, %v974_v33, %v661_v25  ;;  %v722_v39 = vsel %vm707_vm9, %v976_v36, %v666_v30  ;;  %v723_v40 = vsel %vm712_vm10, %v976_v36, %v666_v30  ;;  %697 = vst [vmem:[%s1152_s7] sm:$0xff] %v696_v35 }
  0x87   : > { %v719_v41 = vsel %vm1137_vm2, %v717_v37, %v718_v38  ;;  %v724_v18 = vsel %vm1137_vm2, %v722_v39, %v723_v40 }
  0x88   : > { %977 = vst [vmem:[%s1146_s6 + $0x8] sm:$0xff] %v719_v41 }
  0x89   : > { %978 = vst [vmem:[%s1152_s7 + $0x8] sm:$0xff] %v724_v18 }
  0x8a   : > { %1043 = shalt.err (!%p1040_p9)
}
  0x8b   : > { %s1072_s29 = smov 128   ;;  %s1073_s30 = smov 8   ;;  %790 = vst [vmem:[%s758_s20] sm:$0xff] %v696_v35 }
  0x8c   : > { %752 = dma.vmem_to_hbm [thread:$0]  %s745_s15, 256, %s747_s18, %s728_s21, %s1072_s29, %s1072_s29, %s1073_s30  }
  0x8d   : > { %792 = vst [vmem:[%s758_s20 + $0x8] sm:$0xff] %v724_v18 }
  0x8e PF: > { %s801_s16 = sand.u32 1, %s898_s16  }
  0x8f   : > { %s802_s4 = scalar_lea.sflag [#allocation2], %s801_s16 }
  0x90   : > { %1057 = dma.done.wait (%p900_p1), %s802_s4, 256  }
  0x91   : > { %1059 = vsyncadd (%p900_p1), %s802_s4, 4294967040  ;;  %s13_s14 = sadd.s32 1, %s1070_s14   ;;  %s1347_s12 = smov %s1066_s13 }
  0x92   : > { %p10_p10 = scmp.ge.s32.totalorder %s13_s14, 4   ;;  %s1348_s13 = smov %s1350_s17 }
  0x94   :  { %12 = sbr.rel (!%p10_p10) target bundleno = 3 (0x3), region = 211 }
  0x99   :  { %812 = vsyncpa [#allocation2], 1 }
  0x9a   :  { %814 = vsyncpa [#allocation2 + $0x1], 1 }

// kernel: dgcnn_forward.9
= control target key start
LH: loop header
LB: loop body
LE: loop exit
PB: predicated region body
PF: predicated region fallthrough
CT: control target
= control target key end

     0   :  { %s559_s12 = smov 0   ;;  %s561_s13 = smov 0   ;;  %s598_s0 = inlined_call_operand.vmem [shape: bf16[2,16,8], index: 0, kind: input, shape index: {}, may-alias: {0,1}]   ;;  %s599_s1 = inlined_call_operand.vmem [shape: bf16[2,16,8], index: 1, kind: input, shape index: {}, may-alias: {0,1}]   ;;  %s600_s2 = inlined_call_operand.vmem [shape: f32[2,1,16], index: 2, kind: input, shape index: {}]   ;;  %s601_s3 = inlined_call_operand.vmem [shape: f32[2,16,16], index: 3, kind: output, shape index: {}]  }
   0x1   :  { %s563_s14 = smov 0  }
   0x2 LB: > { %s32_s15 = sadd.s32 1, %s533_s13  ;;  %p467_p0 = scmp.ge.s32.totalorder %s537_s14, 1  ;;  %s537_s14 = sphi %s563_s14, %s13_s14   ;;  %s533_s13 = sphi %s561_s13, %s603_s13   ;;  %s529_s12 = sphi %s559_s12, %s602_s12  }
   0x3   : > { %p34_p1 = scmp.ge.s32.totalorder %s32_s15, 2  ;;  %p197_p2 = scmp.lt.s32.totalorder %s537_s14, 3 }
   0x5   : > { %s605_s15 = smov (%p34_p1, %s32_s15), 0  ;;  %p198_p3 = pnand %p467_p0, %p197_p2 }
   0x6   : > { %p248_p4 = scmp.lt.s32.totalorder (!%p198_p3), %s529_s12, 1 }
   0x7   : > { %201 = sbr.rel (%p198_p3) target bundleno = 163 (0xa3), region = 32 }
   0xc   : > { %s607_s12 = smov (!%p248_p4, %s529_s12), 1  ;;  %vm301_vm0 = vcmask 64512   ;;  %vm330_vm1 = vcmask 130048  }
   0xd   : > { %s485_s16 = sshll.u32 %s607_s12, 3  ;;  %s272_s19 = scalar_lea.vmem %s600_s2, %s607_s12 }
   0xe   : > { %s265_s22 = scalar_lea.vmem %s599_s1, %s485_s16  ;;  %s255_s25 = scalar_lea.vmem %s598_s0, %s485_s16  ;;  %v514_v3 = vld [vmem:[%s272_s19] ss:$0 sm:$0xff] }
   0xf   : > { %v489_v0 = vld [vmem:[%s265_s22] sm:$0xff]  ;;  %s487_s26 = sshll.u32 %s607_s12, 4 }
  0x10   : > { %v306_v1 = vsel %vm301_vm0, %v489_v0, 0  ;;  %v488_v2 = vld [vmem:[%s255_s25] sm:$0xff]  ;;  %s284_s29 = scalar_lea.vmem %s601_s3, %s487_s26 }
  0x11   : > { %315 = vmatpush.bf16.xpose.msra.mxu0 %v306_v1 }
  0x18   : > { %482 = vmatmul.msk.bf16.vlgmr.msra.gmra.mxu0 %vm301_vm0, %v488_v2 }
  0x95   : > { %v317_v4 = vpop.f32.mrf.mxu0 }
  0x96   : > { %v322_v5 = vmul.f32 2.0, %v317_v4 }
  0x98   : > { %v328_v6 = vsub.f32 %v322_v5, %v514_v3 }
  0x9a   : > { %331 = vst.msk [vmem:[%s284_s29] sm:$0xff] %vm330_vm1, %v328_v6 }
  0x9d   : > { %v319_v7 = vpop.f32.mrf.mxu0 }
  0x9e   : > { %v323_v8 = vmul.f32 2.0, %v319_v7 }
  0xa0   : > { %v329_v9 = vsub.f32 %v323_v8, %v514_v3 }
  0xa2   : > { %332 = vst.msk [vmem:[%s284_s29 + $0x8] sm:$0xff] %vm330_vm1, %v329_v9 }
  0xa3 PF: > { %s13_s14 = sadd.s32 1, %s537_s14   ;;  %s602_s12 = smov %s533_s13 }
  0xa4   : > { %p10_p5 = scmp.ge.s32.totalorder %s13_s14, 4   ;;  %s603_s13 = smov %s605_s15 }
  0xa6   :  { %12 = sbr.rel (!%p10_p5) target bundleno = 2 (0x2), region = 68 }

// kernel: dgcnn_forward.11
= control target key start
LH: loop header
LB: loop body
LE: loop exit
PB: predicated region body
PF: predicated region fallthrough
CT: control target
= control target key end

     0   :  { %s559_s12 = smov 0   ;;  %s561_s13 = smov 0   ;;  %s598_s0 = inlined_call_operand.vmem [shape: bf16[2,16,64], index: 0, kind: input, shape index: {}, may-alias: {0,1}]   ;;  %s599_s1 = inlined_call_operand.vmem [shape: bf16[2,16,64], index: 1, kind: input, shape index: {}, may-alias: {0,1}]   ;;  %s600_s2 = inlined_call_operand.vmem [shape: f32[2,1,16], index: 2, kind: input, shape index: {}]   ;;  %s601_s3 = inlined_call_operand.vmem [shape: f32[2,16,16], index: 3, kind: output, shape index: {}]  }
   0x1   :  { %s563_s14 = smov 0  }
   0x2 LB: > { %s32_s15 = sadd.s32 1, %s533_s13  ;;  %p467_p0 = scmp.ge.s32.totalorder %s537_s14, 1  ;;  %s537_s14 = sphi %s563_s14, %s13_s14   ;;  %s533_s13 = sphi %s561_s13, %s603_s13   ;;  %s529_s12 = sphi %s559_s12, %s602_s12  }
   0x3   : > { %p34_p1 = scmp.ge.s32.totalorder %s32_s15, 2  ;;  %p197_p2 = scmp.lt.s32.totalorder %s537_s14, 3 }
   0x5   : > { %s605_s15 = smov (%p34_p1, %s32_s15), 0  ;;  %p198_p3 = pnand %p467_p0, %p197_p2 }
   0x6   : > { %p248_p4 = scmp.lt.s32.totalorder (!%p198_p3), %s529_s12, 1 }
   0x7   : > { %201 = sbr.rel (%p198_p3) target bundleno = 163 (0xa3), region = 32 }
   0xc   : > { %s607_s12 = smov (!%p248_p4, %s529_s12), 1  ;;  %vm301_vm0 = vcmask 523264   ;;  %vm330_vm1 = vcmask 130048  }
   0xd   : > { %s485_s16 = sshll.u32 %s607_s12, 3  ;;  %s272_s19 = scalar_lea.vmem %s600_s2, %s607_s12 }
   0xe   : > { %s265_s22 = scalar_lea.vmem %s599_s1, %s485_s16  ;;  %s255_s25 = scalar_lea.vmem %s598_s0, %s485_s16  ;;  %v514_v3 = vld [vmem:[%s272_s19] ss:$0 sm:$0xff] }
   0xf   : > { %v489_v0 = vld [vmem:[%s265_s22] sm:$0xff]  ;;  %s487_s26 = sshll.u32 %s607_s12, 4 }
  0x10   : > { %v306_v1 = vsel %vm301_vm0, %v489_v0, 0  ;;  %v488_v2 = vld [vmem:[%s255_s25] sm:$0xff]  ;;  %s284_s29 = scalar_lea.vmem %s601_s3, %s487_s26 }
  0x11   : > { %315 = vmatpush.bf16.xpose.msra.mxu0 %v306_v1 }
  0x18   : > { %482 = vmatmul.msk.bf16.vlgmr.msra.gmra.mxu0 %vm301_vm0, %v488_v2 }
  0x95   : > { %v317_v4 = vpop.f32.mrf.mxu0 }
  0x96   : > { %v322_v5 = vmul.f32 2.0, %v317_v4 }
  0x98   : > { %v328_v6 = vsub.f32 %v322_v5, %v514_v3 }
  0x9a   : > { %331 = vst.msk [vmem:[%s284_s29] sm:$0xff] %vm330_vm1, %v328_v6 }
  0x9d   : > { %v319_v7 = vpop.f32.mrf.mxu0 }
  0x9e   : > { %v323_v8 = vmul.f32 2.0, %v319_v7 }
  0xa0   : > { %v329_v9 = vsub.f32 %v323_v8, %v514_v3 }
  0xa2   : > { %332 = vst.msk [vmem:[%s284_s29 + $0x8] sm:$0xff] %vm330_vm1, %v329_v9 }
  0xa3 PF: > { %s13_s14 = sadd.s32 1, %s537_s14   ;;  %s602_s12 = smov %s533_s13 }
  0xa4   : > { %p10_p5 = scmp.ge.s32.totalorder %s13_s14, 4   ;;  %s603_s13 = smov %s605_s15 }
  0xa6   :  { %12 = sbr.rel (!%p10_p5) target bundleno = 2 (0x2), region = 68 }

// kernel: dgcnn_forward.10
= control target key start
LH: loop header
LB: loop body
LE: loop exit
PB: predicated region body
PF: predicated region fallthrough
CT: control target
= control target key end

     0   :  { %vm43_vm0 = vcmask 1043456   ;;  %vm36_vm1 = vcmask 64512   ;;  %s479_s2 = inlined_call_operand.vmem [shape: bf16[8,128], index: 2, kind: input, shape index: {}]   ;;  %s480_s0 = inlined_call_operand.vmem [shape: bf16[4,32,8], index: 0, kind: input, shape index: {}]   ;;  %s481_s3 = inlined_call_operand.vmem [shape: bf16[8,128], index: 3, kind: input, shape index: {}]   ;;  %s482_s1 = inlined_call_operand.vmem [shape: bf16[32,8], index: 1, kind: input, shape index: {}]   ;;  %s483_s4 = inlined_call_operand.vmem [shape: f32[1,128], index: 4, kind: input, shape index: {}]   ;;  %s484_s5 = inlined_call_operand.vmem [shape: bf16[32,128], index: 5, kind: output, shape index: {}]  }
   0x1   :  { %v21_v0 = vld [vmem:[%s479_s2] sm:$0xf]  ;;  %v372_v3 = vld [vmem:[%s480_s0 + $0x8] sm:$0xff]  ;;  %v377_v7 = vld [vmem:[%s480_s0 + $0x30] sm:$0xff] }
   0x2   :  { %v45_v1 = vsel %vm43_vm0, %v21_v0, 0  ;;  %v371_v2 = vld [vmem:[%s480_s0] sm:$0xff]  ;;  %v373_v8 = vld [vmem:[%s480_s0 + $0x10] sm:$0xff]  ;;  %v376_v10 = vld [vmem:[%s480_s0 + $0x28] sm:$0xff] }
   0x3   :  { %v234_v4 = vld [vmem:[%s481_s3] sm:$0xf]  ;;  %54 = vmatpush.bf16.msra.mxu0 %v45_v1  ;;  %392 = vmatpush.bf16.msra.mxu1 %v45_v1  ;;  %v378_v11 = vld [vmem:[%s480_s0 + $0x38] sm:$0xff]  ;;  %v380_v13 = vld [vmem:[%s482_s1 + $0x8] sm:$0xff] }
   0x4   :  { %v375_v5 = vld [vmem:[%s480_s0 + $0x20] sm:$0xff]  ;;  %v252_v6 = vsel %vm43_vm0, %v234_v4, 0  ;;  %150 = vmatpush.bf16.msra.mxu2 %v45_v1  ;;  %202 = vmatpush.bf16.msra.mxu3 %v45_v1  ;;  %v374_v12 = vld [vmem:[%s480_s0 + $0x18] sm:$0xff] }
   0x5   :  { %v379_v9 = vld [vmem:[%s482_s1] sm:$0xff] }
   0x6   :  { %317 = vmatmul.msk.bf16.vlgmr.msra.gmra.mxu0 %vm36_vm1, %v371_v2  ;;  %318 = vmatmul.msk.bf16.vlgmr.msra.gmra.mxu1 %vm36_vm1, %v372_v3  ;;  %v393_v29 = vld [vmem:[%s483_s4] ss:$0 sm:$0xff] }
   0x7   :  { %98 = vmatpush.bf16.msrb.mxu1 %v45_v1  ;;  %261 = vmatpush.bf16.msrb.mxu0 %v252_v6 }
   0x8   :  { %345 = vmatmul.msk.bf16.vlgmr.msra.gmra.mxu2 %vm36_vm1, %v375_v5  ;;  %359 = vmatmul.msk.bf16.vlgmr.msra.gmra.mxu3 %vm36_vm1, %v377_v7 }
  0x16   :  { %331 = vmatmul.msk.bf16.vlgmr.msrb.gmra.mxu1 %vm36_vm1, %v373_v8  ;;  %369 = vmatmul.msk.bf16.vlgmr.msrb.gmra.mxu0 %vm36_vm1, %v379_v9 }
  0x18   :  { %346 = vmatmul.msk.bf16.gmra.mxu2 %vm36_vm1, %v376_v10  ;;  %360 = vmatmul.msk.bf16.gmra.mxu3 %vm36_vm1, %v378_v11 }
  0x26   :  { %332 = vmatmul.msk.bf16.gmra.mxu1 %vm36_vm1, %v374_v12  ;;  %370 = vmatmul.msk.bf16.gmra.mxu0 %vm36_vm1, %v380_v13 }
  0x83   :  { %v56_v14 = vpop.f32.mrf.mxu0  ;;  %v61_v15 = vpop.f32.mrf.mxu1 }
  0x8b   :  { %v58_v16 = vpop.f32.mrf.mxu0  ;;  %v63_v17 = vpop.f32.mrf.mxu1 }
  0x8c   :  { %v152_v18 = vpop.f32.mrf.mxu2  ;;  %v204_v19 = vpop.f32.mrf.mxu3 }
  0x93   :  { %v100_v20 = vpop.f32.mrf.mxu1  ;;  %v263_v21 = vpop.f32.mrf.mxu0 }
  0x94   :  { %v114_v22 = vmax.f32 %v56_v14, %v100_v20  ;;  %v154_v25 = vpop.f32.mrf.mxu2  ;;  %v206_v26 = vpop.f32.mrf.mxu3 }
  0x96   :  { %v166_v23 = vmax.f32 %v114_v22, %v152_v18 }
  0x98   :  { %v218_v24 = vmax.f32 %v166_v23, %v204_v19 }
  0x9a   :  { %v273_v28 = vadd.f32 %v263_v21, %v218_v24 }
  0x9b   :  { %v102_v27 = vpop.f32.mrf.mxu1  ;;  %v265_v31 = vpop.f32.mrf.mxu0 }
  0x9c   :  { %v115_v30 = vmax.f32 %v58_v16, %v102_v27  ;;  %v281_v33 = vadd.f32 %v393_v29, %v273_v28  ;;  %v157_v36 = vpop.f32.mrf.mxu2  ;;  %v209_v41 = vpop.f32.mrf.mxu3 }
  0x9e   :  { %v167_v32 = vmax.f32 %v115_v30, %v154_v25  ;;  %v289_v38 = vmul.f32 0.2, %v281_v33  ;;  %vm285_vm2 = vcmp.gt.f32.partialorder %v281_v33, 0.0 }
  0xa0   :  { %v219_v34 = vmax.f32 %v167_v32, %v206_v26  ;;  %v293_v45 = vsel %vm285_vm2, %v281_v33, %v289_v38 }
  0xa2   :  { %v274_v35 = vadd.f32 %v265_v31, %v219_v34 }
  0xa3   :  { %v105_v37 = vpop.f32.mrf.mxu1  ;;  %v268_v44 = vpop.f32.mrf.mxu0 }
  0xa4   :  { %v282_v39 = vadd.f32 %v393_v29, %v274_v35  ;;  %v116_v40 = vmax.f32 %v61_v15, %v105_v37  ;;  %v159_v52 = vpop.f32.mrf.mxu2  ;;  %v211_v54 = vpop.f32.mrf.mxu3 }
  0xa6   :  { %vm286_vm3 = vcmp.gt.f32.partialorder %v282_v39, 0.0  ;;  %v290_v42 = vmul.f32 0.2, %v282_v39  ;;  %v168_v43 = vmax.f32 %v116_v40, %v157_v36 }
  0xa8   :  { %v294_v46 = vsel %vm286_vm3, %v282_v39, %v290_v42  ;;  %v220_v47 = vmax.f32 %v168_v43, %v209_v41 }
  0xa9   :  { %v384_v48 = vpack.c.bf16 %v294_v46, %v293_v45 }
  0xaa   :  { %v275_v50 = vadd.f32 %v268_v44, %v220_v47 }
  0xab   :  { %385 = vst [vmem:[%s484_s5] sm:$0xff] %v384_v48   ;;  %v107_v49 = vpop.f32.mrf.mxu1  ;;  %v270_v57 = vpop.f32.mrf.mxu0 }
  0xac   :  { %v117_v51 = vmax.f32 %v63_v17, %v107_v49  ;;  %v283_v55 = vadd.f32 %v393_v29, %v275_v50 }
  0xae   :  { %v169_v53 = vmax.f32 %v117_v51, %v159_v52  ;;  %v291_v59 = vmul.f32 0.2, %v283_v55  ;;  %vm287_vm4 = vcmp.gt.f32.partialorder %v283_v55, 0.0 }
  0xb0   :  { %v221_v56 = vmax.f32 %v169_v53, %v211_v54  ;;  %v295_v62 = vsel %vm287_vm4, %v283_v55, %v291_v59 }
  0xb2   :  { %v276_v58 = vadd.f32 %v270_v57, %v221_v56 }
  0xb4   :  { %v284_v60 = vadd.f32 %v393_v29, %v276_v58 }
  0xb6   :  { %vm288_vm5 = vcmp.gt.f32.partialorder %v284_v60, 0.0  ;;  %v292_v61 = vmul.f32 0.2, %v284_v60 }
  0xb8   :  { %v296_v63 = vsel %vm288_vm5, %v284_v60, %v292_v61 }
  0xb9   :  { %v389_v0 = vpack.c.bf16 %v296_v63, %v295_v62 }
  0xbb   :  { %391 = vst [vmem:[%s484_s5 + $0x8] sm:$0xff] %v389_v0  }

// kernel: dgcnn_forward.15
= control target key start
LH: loop header
LB: loop body
LE: loop exit
PB: predicated region body
PF: predicated region fallthrough
CT: control target
= control target key end

     0   :  { %s553_s12 = smov 0   ;;  %s555_s13 = smov 0   ;;  %s589_s0 = inlined_call_operand.vmem [shape: bf16[2,16,128], index: 0, kind: input, shape index: {}, may-alias: {0,1}]   ;;  %s590_s1 = inlined_call_operand.vmem [shape: bf16[2,16,128], index: 1, kind: input, shape index: {}, may-alias: {0,1}]   ;;  %s591_s2 = inlined_call_operand.vmem [shape: f32[2,1,16], index: 2, kind: input, shape index: {}]   ;;  %s592_s3 = inlined_call_operand.vmem [shape: f32[2,16,16], index: 3, kind: output, shape index: {}]  }
   0x1   :  { %s557_s14 = smov 0  }
   0x2 LB: > { %s32_s15 = sadd.s32 1, %s527_s13  ;;  %p462_p0 = scmp.ge.s32.totalorder %s531_s14, 1  ;;  %s531_s14 = sphi %s557_s14, %s13_s14   ;;  %s527_s13 = sphi %s555_s13, %s594_s13   ;;  %s523_s12 = sphi %s553_s12, %s593_s12  }
   0x3   : > { %p34_p1 = scmp.ge.s32.totalorder %s32_s15, 2  ;;  %p197_p2 = scmp.lt.s32.totalorder %s531_s14, 3 }
   0x5   : > { %s596_s15 = smov (%p34_p1, %s32_s15), 0  ;;  %p198_p3 = pnand %p462_p0, %p197_p2 }
   0x6   : > { %p248_p4 = scmp.lt.s32.totalorder (!%p198_p3), %s523_s12, 1 }
   0x7   : > { %201 = sbr.rel (%p198_p3) target bundleno = 162 (0xa2), region = 32 }
   0xc   : > { %s598_s12 = smov (!%p248_p4, %s523_s12), 1  ;;  %vm325_vm0 = vcmask 130048  }
   0xd   : > { %s479_s16 = sshll.u32 %s598_s12, 3  ;;  %s272_s19 = scalar_lea.vmem %s591_s2, %s598_s12 }
   0xe   : > { %s265_s22 = scalar_lea.vmem %s590_s1, %s479_s16  ;;  %s255_s25 = scalar_lea.vmem %s589_s0, %s479_s16  ;;  %v508_v2 = vld [vmem:[%s272_s19] ss:$0 sm:$0xff] }
   0xf   : > { %v483_v0 = vld [vmem:[%s265_s22] sm:$0xff]  ;;  %s481_s26 = sshll.u32 %s598_s12, 4 }
  0x10   : > { %310 = vmatpush.bf16.xpose.msra.mxu0 %v483_v0  ;;  %v482_v1 = vld [vmem:[%s255_s25] sm:$0xff]  ;;  %s284_s29 = scalar_lea.vmem %s592_s3, %s481_s26 }
  0x17   : > { %311 = vmatmul.bf16.vlgmr.msra.gmra.mxu0 %v482_v1 }
  0x94   : > { %v312_v3 = vpop.f32.mrf.mxu0 }
  0x95   : > { %v317_v4 = vmul.f32 2.0, %v312_v3 }
  0x97   : > { %v323_v5 = vsub.f32 %v317_v4, %v508_v2 }
  0x99   : > { %326 = vst.msk [vmem:[%s284_s29] sm:$0xff] %vm325_vm0, %v323_v5 }
  0x9c   : > { %v314_v6 = vpop.f32.mrf.mxu0 }
  0x9d   : > { %v318_v7 = vmul.f32 2.0, %v314_v6 }
  0x9f   : > { %v324_v8 = vsub.f32 %v318_v7, %v508_v2 }
  0xa1   : > { %327 = vst.msk [vmem:[%s284_s29 + $0x8] sm:$0xff] %vm325_vm0, %v324_v8 }
  0xa2 PF: > { %s13_s14 = sadd.s32 1, %s531_s14   ;;  %s593_s12 = smov %s527_s13 }
  0xa3   : > { %p10_p5 = scmp.ge.s32.totalorder %s13_s14, 4   ;;  %s594_s13 = smov %s596_s15 }
  0xa5   :  { %12 = sbr.rel (!%p10_p5) target bundleno = 2 (0x2), region = 68 }

// kernel: dgcnn_forward.12
= control target key start
LH: loop header
LB: loop body
LE: loop exit
PB: predicated region body
PF: predicated region fallthrough
CT: control target
= control target key end

     0   :  { %vm67_vm0 = vcmask 523264   ;;  %s595_s2 = inlined_call_operand.vmem [shape: bf16[64,128], index: 2, kind: input, shape index: {}]   ;;  %s596_s3 = inlined_call_operand.vmem [shape: bf16[64,128], index: 3, kind: input, shape index: {}]   ;;  %s597_s0 = inlined_call_operand.vmem [shape: bf16[4,32,64], index: 0, kind: input, shape index: {}]   ;;  %s598_s1 = inlined_call_operand.vmem [shape: bf16[32,64], index: 1, kind: input, shape index: {}]   ;;  %s599_s4 = inlined_call_operand.vmem [shape: f32[1,128], index: 4, kind: input, shape index: {}]   ;;  %s600_s5 = inlined_call_operand.vmem [shape: bf16[32,128], index: 5, kind: output, shape index: {}]  }
   0x1   :  { %v461_v0 = vld [vmem:[%s595_s2 + $0x18] sm:$0xff]  ;;  %v460_v1 = vld [vmem:[%s595_s2 + $0x10] sm:$0xff]  ;;  %v459_v2 = vld [vmem:[%s595_s2 + $0x8] sm:$0xff] }
   0x2   :  { %78 = vmatpush.bf16.msra.mxu0 %v461_v0  ;;  %487 = vmatpush.bf16.msra.mxu1 %v461_v0  ;;  %v458_v3 = vld [vmem:[%s595_s2] sm:$0xff]  ;;  %v475_v4 = vld [vmem:[%s596_s3 + $0x18] sm:$0xff]  ;;  %v463_v6 = vld [vmem:[%s597_s0 + $0x8] sm:$0xff] }
   0x3   :  { %174 = vmatpush.bf16.msra.mxu2 %v461_v0  ;;  %226 = vmatpush.bf16.msra.mxu3 %v461_v0  ;;  %v462_v5 = vld [vmem:[%s597_s0] sm:$0xff]  ;;  %v468_v8 = vld [vmem:[%s597_s0 + $0x30] sm:$0xff]  ;;  %v473_v10 = vld [vmem:[%s596_s3 + $0x8] sm:$0xff] }
   0x4   :  { %v466_v7 = vld [vmem:[%s597_s0 + $0x20] sm:$0xff]  ;;  %v474_v9 = vld [vmem:[%s596_s3 + $0x10] sm:$0xff]  ;;  %v467_v14 = vld [vmem:[%s597_s0 + $0x28] sm:$0xff] }
   0x5   :  { %v472_v11 = vld [vmem:[%s596_s3] sm:$0xff]  ;;  %v464_v12 = vld [vmem:[%s597_s0 + $0x10] sm:$0xff]  ;;  %v469_v15 = vld [vmem:[%s597_s0 + $0x38] sm:$0xff] }
   0x6   :  { %79 = vmatpush.bf16.msra.mxu0 %v460_v1  ;;  %488 = vmatpush.bf16.msra.mxu1 %v460_v1  ;;  %v470_v13 = vld [vmem:[%s598_s1] sm:$0xff]  ;;  %v465_v16 = vld [vmem:[%s597_s0 + $0x18] sm:$0xff]  ;;  %v471_v17 = vld [vmem:[%s598_s1 + $0x8] sm:$0xff] }
   0x7   :  { %175 = vmatpush.bf16.msra.mxu2 %v460_v1  ;;  %227 = vmatpush.bf16.msra.mxu3 %v460_v1  ;;  %v491_v33 = vld [vmem:[%s599_s4] ss:$0 sm:$0xff] }
   0xa   :  { %80 = vmatpush.bf16.msra.mxu0 %v459_v2  ;;  %489 = vmatpush.bf16.msra.mxu1 %v459_v2 }
   0xb   :  { %176 = vmatpush.bf16.msra.mxu2 %v459_v2  ;;  %228 = vmatpush.bf16.msra.mxu3 %v459_v2 }
   0xe   :  { %81 = vmatpush.bf16.msra.mxu0 %v458_v3  ;;  %490 = vmatpush.bf16.msra.mxu1 %v458_v3 }
   0xf   :  { %177 = vmatpush.bf16.msra.mxu2 %v458_v3  ;;  %229 = vmatpush.bf16.msra.mxu3 %v458_v3 }
  0x11   :  { %388 = vmatmul.msk.bf16.vlgmr.msra.gmra.mxu0 %vm67_vm0, %v462_v5  ;;  %389 = vmatmul.msk.bf16.vlgmr.msra.gmra.mxu1 %vm67_vm0, %v463_v6 }
  0x12   :  { %122 = vmatpush.bf16.msrb.mxu1 %v461_v0  ;;  %313 = vmatpush.bf16.msrb.mxu0 %v475_v4 }
  0x13   :  { %416 = vmatmul.msk.bf16.vlgmr.msra.gmra.mxu2 %vm67_vm0, %v466_v7  ;;  %430 = vmatmul.msk.bf16.vlgmr.msra.gmra.mxu3 %vm67_vm0, %v468_v8 }
  0x16   :  { %123 = vmatpush.bf16.msrb.mxu1 %v460_v1  ;;  %314 = vmatpush.bf16.msrb.mxu0 %v474_v9 }
  0x1a   :  { %124 = vmatpush.bf16.msrb.mxu1 %v459_v2  ;;  %315 = vmatpush.bf16.msrb.mxu0 %v473_v10 }
  0x1e   :  { %125 = vmatpush.bf16.msrb.mxu1 %v458_v3  ;;  %316 = vmatpush.bf16.msrb.mxu0 %v472_v11 }
  0x21   :  { %402 = vmatmul.msk.bf16.vlgmr.msrb.gmra.mxu1 %vm67_vm0, %v464_v12  ;;  %456 = vmatmul.msk.bf16.vlgmr.msrb.gmra.mxu0 %vm67_vm0, %v470_v13 }
  0x23   :  { %417 = vmatmul.msk.bf16.gmra.mxu2 %vm67_vm0, %v467_v14  ;;  %431 = vmatmul.msk.bf16.gmra.mxu3 %vm67_vm0, %v469_v15 }
  0x31   :  { %403 = vmatmul.msk.bf16.gmra.mxu1 %vm67_vm0, %v465_v16  ;;  %457 = vmatmul.msk.bf16.gmra.mxu0 %vm67_vm0, %v471_v17 }
  0x8e   :  { %v83_v18 = vpop.f32.mrf.mxu0  ;;  %v88_v19 = vpop.f32.mrf.mxu1 }
  0x96   :  { %v85_v20 = vpop.f32.mrf.mxu0  ;;  %v90_v21 = vpop.f32.mrf.mxu1 }
  0x97   :  { %v179_v22 = vpop.f32.mrf.mxu2  ;;  %v231_v23 = vpop.f32.mrf.mxu3 }
  0x9e   :  { %v127_v24 = vpop.f32.mrf.mxu1  ;;  %v318_v25 = vpop.f32.mrf.mxu0 }
  0x9f   :  { %v141_v26 = vmax.f32 %v83_v18, %v127_v24  ;;  %v181_v29 = vpop.f32.mrf.mxu2  ;;  %v233_v30 = vpop.f32.mrf.mxu3 }
  0xa1   :  { %v193_v27 = vmax.f32 %v141_v26, %v179_v22 }
  0xa3   :  { %v245_v28 = vmax.f32 %v193_v27, %v231_v23 }
  0xa5   :  { %v328_v32 = vadd.f32 %v318_v25, %v245_v28 }
  0xa6   :  { %v129_v31 = vpop.f32.mrf.mxu1  ;;  %v320_v35 = vpop.f32.mrf.mxu0 }
  0xa7   :  { %v142_v34 = vmax.f32 %v85_v20, %v129_v31  ;;  %v336_v37 = vadd.f32 %v491_v33, %v328_v32  ;;  %v184_v40 = vpop.f32.mrf.mxu2  ;;  %v236_v45 = vpop.f32.mrf.mxu3 }
  0xa9   :  { %v194_v36 = vmax.f32 %v142_v34, %v181_v29  ;;  %v344_v42 = vmul.f32 0.2, %v336_v37  ;;  %vm340_vm1 = vcmp.gt.f32.partialorder %v336_v37, 0.0 }
  0xab   :  { %v246_v38 = vmax.f32 %v194_v36, %v233_v30  ;;  %v348_v49 = vsel %vm340_vm1, %v336_v37, %v344_v42 }
  0xad   :  { %v329_v39 = vadd.f32 %v320_v35, %v246_v38 }
  0xae   :  { %v132_v41 = vpop.f32.mrf.mxu1  ;;  %v323_v48 = vpop.f32.mrf.mxu0 }
  0xaf   :  { %v337_v43 = vadd.f32 %v491_v33, %v329_v39  ;;  %v143_v44 = vmax.f32 %v88_v19, %v132_v41  ;;  %v186_v56 = vpop.f32.mrf.mxu2  ;;  %v238_v58 = vpop.f32.mrf.mxu3 }
  0xb1   :  { %vm341_vm2 = vcmp.gt.f32.partialorder %v337_v43, 0.0  ;;  %v345_v46 = vmul.f32 0.2, %v337_v43  ;;  %v195_v47 = vmax.f32 %v143_v44, %v184_v40 }
  0xb3   :  { %v349_v50 = vsel %vm341_vm2, %v337_v43, %v345_v46  ;;  %v247_v51 = vmax.f32 %v195_v47, %v236_v45 }
  0xb4   :  { %v479_v52 = vpack.c.bf16 %v349_v50, %v348_v49 }
  0xb5   :  { %v330_v54 = vadd.f32 %v323_v48, %v247_v51 }
  0xb6   :  { %480 = vst [vmem:[%s600_s5] sm:$0xff] %v479_v52   ;;  %v134_v53 = vpop.f32.mrf.mxu1  ;;  %v325_v61 = vpop.f32.mrf.mxu0 }
  0xb7   :  { %v144_v55 = vmax.f32 %v90_v21, %v134_v53  ;;  %v338_v59 = vadd.f32 %v491_v33, %v330_v54 }
  0xb9   :  { %v196_v57 = vmax.f32 %v144_v55, %v186_v56  ;;  %v346_v63 = vmul.f32 0.2, %v338_v59  ;;  %vm342_vm3 = vcmp.gt.f32.partialorder %v338_v59, 0.0 }
  0xbb   :  { %v248_v60 = vmax.f32 %v196_v57, %v238_v58  ;;  %v350_v2 = vsel %vm342_vm3, %v338_v59, %v346_v63 }
  0xbd   :  { %v331_v62 = vadd.f32 %v325_v61, %v248_v60 }
  0xbf   :  { %v339_v0 = vadd.f32 %v491_v33, %v331_v62 }
  0xc1   :  { %vm343_vm4 = vcmp.gt.f32.partialorder %v339_v0, 0.0  ;;  %v347_v1 = vmul.f32 0.2, %v339_v0 }
  0xc3   :  { %v351_v3 = vsel %vm343_vm4, %v339_v0, %v347_v1 }
  0xc4   :  { %v484_v4 = vpack.c.bf16 %v351_v3, %v350_v2 }
  0xc6   :  { %486 = vst [vmem:[%s600_s5 + $0x8] sm:$0xff] %v484_v4  }

// kernel: dgcnn_forward.16
= control target key start
LH: loop header
LB: loop body
LE: loop exit
PB: predicated region body
PF: predicated region fallthrough
CT: control target
= control target key end

     0   :  { %s1262_s2 = inlined_call_operand.vmem [shape: bf16[128,256], index: 2, kind: input, shape index: {}]   ;;  %s1263_s0 = inlined_call_operand.vmem [shape: bf16[4,32,128], index: 0, kind: input, shape index: {}]   ;;  %s1264_s3 = inlined_call_operand.vmem [shape: bf16[128,256], index: 3, kind: input, shape index: {}]   ;;  %s1265_s1 = inlined_call_operand.vmem [shape: bf16[32,128], index: 1, kind: input, shape index: {}]   ;;  %s1266_s4 = inlined_call_operand.vmem [shape: f32[1,256], index: 4, kind: input, shape index: {}]   ;;  %s1267_s5 = inlined_call_operand.vmem [shape: bf16[32,256], index: 5, kind: output, shape index: {}]  }
   0x1   :  { %v697_v0 = vld [vmem:[%s1262_s2 + $0x70] sm:$0xf]  ;;  %v826_v1 = vld [vmem:[%s1262_s2 + $0x74] sm:$0xf0]  ;;  %v825_v2 = vld [vmem:[%s1262_s2 + $0x74] sm:$0xf] }
   0x2   :  { %v908_v3 = vor.u32 %v826_v1, %v697_v0  ;;  %v699_v4 = vld [vmem:[%s1262_s2 + $0x78] sm:$0xf0]  ;;  %v689_v5 = vld [vmem:[%s1262_s2 + $0x60] sm:$0xf]  ;;  %v824_v6 = vld [vmem:[%s1262_s2 + $0x64] sm:$0xf0] }
   0x3   :  { %v919_v7 = vor.u32 %v825_v2, %v699_v4  ;;  %v823_v8 = vld [vmem:[%s1262_s2 + $0x64] sm:$0xf]  ;;  %v691_v9 = vld [vmem:[%s1262_s2 + $0x68] sm:$0xf0]  ;;  %v929_v10 = vor.u32 %v824_v6, %v689_v5  ;;  %v681_v12 = vld [vmem:[%s1262_s2 + $0x50] sm:$0xf] }
   0x4   :  { %132 = vmatpush.bf16.msra.mxu0 %v908_v3  ;;  %195 = vmatpush.bf16.msra.mxu2 %v908_v3  ;;  %v933_v11 = vor.u32 %v823_v8, %v691_v9  ;;  %v822_v13 = vld [vmem:[%s1262_s2 + $0x54] sm:$0xf0]  ;;  %v821_v14 = vld [vmem:[%s1262_s2 + $0x54] sm:$0xf]  ;;  %v683_v15 = vld [vmem:[%s1262_s2 + $0x58] sm:$0xf0] }
   0x5   :  { %151 = vmatpush.bf16.msra.mxu1 %v919_v7  ;;  %214 = vmatpush.bf16.msra.mxu3 %v919_v7  ;;  %v949_v16 = vor.u32 %v822_v13, %v681_v12  ;;  %v953_v17 = vor.u32 %v821_v14, %v683_v15  ;;  %v673_v18 = vld [vmem:[%s1262_s2 + $0x40] sm:$0xf]  ;;  %v820_v19 = vld [vmem:[%s1262_s2 + $0x44] sm:$0xf0]  ;;  %v819_v20 = vld [vmem:[%s1262_s2 + $0x44] sm:$0xf] }
   0x6   :  { %v675_v21 = vld [vmem:[%s1262_s2 + $0x48] sm:$0xf0]  ;;  %v969_v22 = vor.u32 %v820_v19, %v673_v18  ;;  %v665_v24 = vld [vmem:[%s1262_s2 + $0x30] sm:$0xf]  ;;  %v818_v25 = vld [vmem:[%s1262_s2 + $0x34] sm:$0xf0] }
   0x7   :  { %v973_v23 = vor.u32 %v819_v20, %v675_v21  ;;  %v817_v26 = vld [vmem:[%s1262_s2 + $0x34] sm:$0xf]  ;;  %v667_v27 = vld [vmem:[%s1262_s2 + $0x38] sm:$0xf0]  ;;  %v989_v28 = vor.u32 %v818_v25, %v665_v24  ;;  %v657_v30 = vld [vmem:[%s1262_s2 + $0x20] sm:$0xf] }
   0x8   :  { %133 = vmatpush.bf16.msra.mxu0 %v929_v10  ;;  %196 = vmatpush.bf16.msra.mxu2 %v929_v10  ;;  %v993_v29 = vor.u32 %v817_v26, %v667_v27  ;;  %v816_v31 = vld [vmem:[%s1262_s2 + $0x24] sm:$0xf0]  ;;  %v815_v32 = vld [vmem:[%s1262_s2 + $0x24] sm:$0xf]  ;;  %v659_v33 = vld [vmem:[%s1262_s2 + $0x28] sm:$0xf0] }
   0x9   :  { %152 = vmatpush.bf16.msra.mxu1 %v933_v11  ;;  %215 = vmatpush.bf16.msra.mxu3 %v933_v11  ;;  %v1009_v34 = vor.u32 %v816_v31, %v657_v30  ;;  %v1013_v35 = vor.u32 %v815_v32, %v659_v33  ;;  %v649_v36 = vld [vmem:[%s1262_s2 + $0x10] sm:$0xf]  ;;  %v814_v37 = vld [vmem:[%s1262_s2 + $0x14] sm:$0xf0]  ;;  %v813_v38 = vld [vmem:[%s1262_s2 + $0x14] sm:$0xf] }
   0xa   :  { %v651_v39 = vld [vmem:[%s1262_s2 + $0x18] sm:$0xf0]  ;;  %v1029_v40 = vor.u32 %v814_v37, %v649_v36  ;;  %v641_v42 = vld [vmem:[%s1262_s2] sm:$0xf]  ;;  %v812_v43 = vld [vmem:[%s1262_s2 + $0x4] sm:$0xf0] }
   0xb   :  { %v1033_v41 = vor.u32 %v813_v38, %v651_v39  ;;  %v811_v44 = vld [vmem:[%s1262_s2 + $0x4] sm:$0xf]  ;;  %v643_v45 = vld [vmem:[%s1262_s2 + $0x8] sm:$0xf0]  ;;  %v1049_v46 = vor.u32 %v812_v43, %v641_v42  ;;  %v829_v49 = vld [vmem:[%s1263_s0 + $0x10] sm:$0xff] }
   0xc   :  { %134 = vmatpush.bf16.msra.mxu0 %v949_v16  ;;  %197 = vmatpush.bf16.msra.mxu2 %v949_v16  ;;  %v1053_v47 = vor.u32 %v811_v44, %v643_v45  ;;  %v827_v48 = vld [vmem:[%s1263_s0] sm:$0xff]  ;;  %v828_v50 = vld [vmem:[%s1263_s0 + $0x8] sm:$0xff]  ;;  %v830_v51 = vld [vmem:[%s1263_s0 + $0x18] sm:$0xff] }
   0xd   :  { %153 = vmatpush.bf16.msra.mxu1 %v953_v17  ;;  %216 = vmatpush.bf16.msra.mxu3 %v953_v17  ;;  %v805_v52 = vld [vmem:[%s1264_s3 + $0x70] sm:$0xf]  ;;  %v852_v53 = vld [vmem:[%s1264_s3 + $0x74] sm:$0xf0]  ;;  %v851_v54 = vld [vmem:[%s1264_s3 + $0x74] sm:$0xf] }
   0xe   :  { %v807_v55 = vld [vmem:[%s1264_s3 + $0x78] sm:$0xf0]  ;;  %v806_v56 = vor.u32 %v852_v53, %v805_v52  ;;  %v849_v58 = vld [vmem:[%s1264_s3 + $0x64] sm:$0xf]  ;;  %v799_v59 = vld [vmem:[%s1264_s3 + $0x68] sm:$0xf0] }
   0xf   :  { %v810_v57 = vor.u32 %v851_v54, %v807_v55  ;;  %v797_v60 = vld [vmem:[%s1264_s3 + $0x60] sm:$0xf]  ;;  %v850_v61 = vld [vmem:[%s1264_s3 + $0x64] sm:$0xf0]  ;;  %v833_v62 = vld [vmem:[%s1263_s0 + $0x30] sm:$0xff]  ;;  %v802_v63 = vor.u32 %v849_v58, %v799_v59 }
  0x10   :  { %135 = vmatpush.bf16.msra.mxu0 %v969_v22  ;;  %198 = vmatpush.bf16.msra.mxu2 %v969_v22  ;;  %v831_v0 = vld [vmem:[%s1263_s0 + $0x20] sm:$0xff]  ;;  %v847_v1 = vld [vmem:[%s1264_s3 + $0x54] sm:$0xf]  ;;  %v791_v2 = vld [vmem:[%s1264_s3 + $0x58] sm:$0xf0] }
  0x11   :  { %154 = vmatpush.bf16.msra.mxu1 %v973_v23  ;;  %217 = vmatpush.bf16.msra.mxu3 %v973_v23  ;;  %v789_v4 = vld [vmem:[%s1264_s3 + $0x50] sm:$0xf]  ;;  %v848_v5 = vld [vmem:[%s1264_s3 + $0x54] sm:$0xf0]  ;;  %v794_v6 = vor.u32 %v847_v1, %v791_v2  ;;  %v783_v8 = vld [vmem:[%s1264_s3 + $0x48] sm:$0xf0] }
  0x12   :  { %v790_v9 = vor.u32 %v848_v5, %v789_v4  ;;  %v843_v13 = vld [vmem:[%s1264_s3 + $0x34] sm:$0xf]  ;;  %v775_v14 = vld [vmem:[%s1264_s3 + $0x38] sm:$0xf0]  ;;  %v841_v19 = vld [vmem:[%s1264_s3 + $0x24] sm:$0xf] }
  0x13   :  { %v778_v18 = vor.u32 %v843_v13, %v775_v14  ;;  %v767_v20 = vld [vmem:[%s1264_s3 + $0x28] sm:$0xf0]  ;;  %v834_v24 = vld [vmem:[%s1263_s0 + $0x38] sm:$0xff]  ;;  %v839_v27 = vld [vmem:[%s1264_s3 + $0x14] sm:$0xf] }
  0x14   :  { %136 = vmatpush.bf16.msra.mxu0 %v989_v28  ;;  %199 = vmatpush.bf16.msra.mxu2 %v989_v28  ;;  %v770_v25 = vor.u32 %v841_v19, %v767_v20  ;;  %v832_v26 = vld [vmem:[%s1263_s0 + $0x28] sm:$0xff]  ;;  %v757_v30 = vld [vmem:[%s1264_s3 + $0x10] sm:$0xf]  ;;  %v840_v31 = vld [vmem:[%s1264_s3 + $0x14] sm:$0xf0] }
  0x15   :  { %155 = vmatpush.bf16.msra.mxu1 %v993_v29  ;;  %218 = vmatpush.bf16.msra.mxu3 %v993_v29  ;;  %v837_v33 = vld [vmem:[%s1264_s3 + $0x4] sm:$0xf]  ;;  %v749_v36 = vld [vmem:[%s1264_s3] sm:$0xf]  ;;  %v838_v37 = vld [vmem:[%s1264_s3 + $0x4] sm:$0xf0] }
  0x16   :  { %v750_v39 = vor.u32 %v838_v37, %v749_v36 }
  0x18   :  { %137 = vmatpush.bf16.msra.mxu0 %v1009_v34  ;;  %200 = vmatpush.bf16.msra.mxu2 %v1009_v34 }
  0x19   :  { %156 = vmatpush.bf16.msra.mxu1 %v1013_v35  ;;  %219 = vmatpush.bf16.msra.mxu3 %v1013_v35 }
  0x1c   :  { %138 = vmatpush.bf16.msra.mxu0 %v1029_v40  ;;  %201 = vmatpush.bf16.msra.mxu2 %v1029_v40 }
  0x1d   :  { %157 = vmatpush.bf16.msra.mxu1 %v1033_v41  ;;  %220 = vmatpush.bf16.msra.mxu3 %v1033_v41 }
  0x20   :  { %139 = vmatpush.bf16.msra.mxu0 %v1049_v46  ;;  %202 = vmatpush.bf16.msra.mxu2 %v1049_v46 }
  0x21   :  { %158 = vmatpush.bf16.msra.mxu1 %v1053_v47  ;;  %221 = vmatpush.bf16.msra.mxu3 %v1053_v47 }
  0x23   :  { %140 = vmatmul.bf16.vlgmr.msra.gmra.mxu0 %v827_v48  ;;  %203 = vmatmul.bf16.vlgmr.msra.gmra.mxu2 %v829_v49 }
  0x24   :  { %353 = vmatpush.bf16.msrb.mxu2 %v908_v3  ;;  %159 = vmatmul.bf16.vlgmr.msra.gmra.mxu1 %v827_v48 }
  0x25   :  { %372 = vmatpush.bf16.msrb.mxu3 %v919_v7  ;;  %274 = vmatpush.bf16.msrb.mxu0 %v908_v3  ;;  %v798_v3 = vor.u32 %v850_v61, %v797_v60 }
  0x26   :  { %222 = vmatmul.bf16.vlgmr.msra.gmra.mxu3 %v829_v49  ;;  %293 = vmatpush.bf16.msrb.mxu1 %v919_v7  ;;  %v845_v7 = vld [vmem:[%s1264_s3 + $0x44] sm:$0xf] }
  0x27   :  { %v786_v12 = vor.u32 %v845_v7, %v783_v8 }
  0x28   :  { %354 = vmatpush.bf16.msrb.mxu2 %v929_v10 }
  0x29   :  { %373 = vmatpush.bf16.msrb.mxu3 %v933_v11  ;;  %275 = vmatpush.bf16.msrb.mxu0 %v929_v10  ;;  %v781_v10 = vld [vmem:[%s1264_s3 + $0x40] sm:$0xf] }
  0x2a   :  { %294 = vmatpush.bf16.msrb.mxu1 %v933_v11  ;;  %v846_v11 = vld [vmem:[%s1264_s3 + $0x44] sm:$0xf0] }
  0x2b   :  { %v782_v15 = vor.u32 %v846_v11, %v781_v10  ;;  %v581_v10 = vld [vmem:[%s1266_s4] sm:$0x3] }
  0x2c   :  { %355 = vmatpush.bf16.msrb.mxu2 %v949_v16 }
  0x2d   :  { %374 = vmatpush.bf16.msrb.mxu3 %v953_v17  ;;  %276 = vmatpush.bf16.msrb.mxu0 %v949_v16  ;;  %v773_v16 = vld [vmem:[%s1264_s3 + $0x30] sm:$0xf] }
  0x2e   :  { %295 = vmatpush.bf16.msrb.mxu1 %v953_v17  ;;  %v844_v17 = vld [vmem:[%s1264_s3 + $0x34] sm:$0xf0] }
  0x2f   :  { %v774_v21 = vor.u32 %v844_v17, %v773_v16  ;;  %v1232_v17 = vperm.slane %v581_v10, 0 }
  0x30   :  { %356 = vmatpush.bf16.msrb.mxu2 %v969_v22 }
  0x31   :  { %375 = vmatpush.bf16.msrb.mxu3 %v973_v23  ;;  %277 = vmatpush.bf16.msrb.mxu0 %v969_v22  ;;  %v765_v22 = vld [vmem:[%s1264_s3 + $0x20] sm:$0xf] }
  0x32   :  { %296 = vmatpush.bf16.msrb.mxu1 %v973_v23  ;;  %v842_v23 = vld [vmem:[%s1264_s3 + $0x24] sm:$0xf0] }
  0x33   :  { %145 = vmatmul.bf16.gmra.mxu0 %v828_v50  ;;  %208 = vmatmul.bf16.gmra.mxu2 %v830_v51 }
  0x34   :  { %357 = vmatpush.bf16.msrb.mxu2 %v989_v28  ;;  %164 = vmatmul.bf16.gmra.mxu1 %v828_v50 }
  0x35   :  { %376 = vmatpush.bf16.msrb.mxu3 %v993_v29  ;;  %278 = vmatpush.bf16.msrb.mxu0 %v989_v28  ;;  %v759_v28 = vld [vmem:[%s1264_s3 + $0x18] sm:$0xf0] }
  0x36   :  { %227 = vmatmul.bf16.gmra.mxu3 %v830_v51  ;;  %297 = vmatpush.bf16.msrb.mxu1 %v993_v29  ;;  %v766_v29 = vor.u32 %v842_v23, %v765_v22  ;;  %v762_v32 = vor.u32 %v839_v27, %v759_v28 }
  0x38   :  { %358 = vmatpush.bf16.msrb.mxu2 %v1009_v34 }
  0x39   :  { %377 = vmatpush.bf16.msrb.mxu3 %v1013_v35  ;;  %279 = vmatpush.bf16.msrb.mxu0 %v1009_v34  ;;  %v751_v34 = vld [vmem:[%s1264_s3 + $0x8] sm:$0xf0] }
  0x3a   :  { %298 = vmatpush.bf16.msrb.mxu1 %v1013_v35  ;;  %v758_v35 = vor.u32 %v840_v31, %v757_v30  ;;  %v754_v38 = vor.u32 %v837_v33, %v751_v34 }
  0x3c   :  { %359 = vmatpush.bf16.msrb.mxu2 %v1029_v40 }
  0x3d   :  { %378 = vmatpush.bf16.msrb.mxu3 %v1033_v41  ;;  %280 = vmatpush.bf16.msrb.mxu0 %v1029_v40  ;;  %v836_v40 = vld [vmem:[%s1265_s1 + $0x8] sm:$0xff] }
  0x3e   :  { %299 = vmatpush.bf16.msrb.mxu1 %v1033_v41  ;;  %v835_v41 = vld [vmem:[%s1265_s1] sm:$0xff] }
  0x40   :  { %360 = vmatpush.bf16.msrb.mxu2 %v1049_v46 }
  0x41   :  { %379 = vmatpush.bf16.msrb.mxu3 %v1053_v47  ;;  %281 = vmatpush.bf16.msrb.mxu0 %v1049_v46 }
  0x42   :  { %300 = vmatpush.bf16.msrb.mxu1 %v1053_v47 }
  0x43   :  { %361 = vmatmul.bf16.vlgmr.msrb.gmra.mxu2 %v833_v62 }
  0x44   :  { %853 = vmatpush.bf16.msra.mxu2 %v806_v56  ;;  %282 = vmatmul.bf16.vlgmr.msrb.gmra.mxu0 %v831_v0 }
  0x45   :  { %861 = vmatpush.bf16.msra.mxu3 %v810_v57  ;;  %535 = vmatpush.bf16.msra.mxu0 %v806_v56 }
  0x46   :  { %554 = vmatpush.bf16.msra.mxu1 %v810_v57  ;;  %380 = vmatmul.bf16.vlgmr.msrb.gmra.mxu3 %v833_v62 }
  0x47   :  { %301 = vmatmul.bf16.vlgmr.msrb.gmra.mxu1 %v831_v0 }
  0x48   :  { %854 = vmatpush.bf16.msra.mxu2 %v798_v3 }
  0x49   :  { %862 = vmatpush.bf16.msra.mxu3 %v802_v63  ;;  %536 = vmatpush.bf16.msra.mxu0 %v798_v3 }
  0x4a   :  { %555 = vmatpush.bf16.msra.mxu1 %v802_v63 }
  0x4c   :  { %855 = vmatpush.bf16.msra.mxu2 %v790_v9 }
  0x4d   :  { %863 = vmatpush.bf16.msra.mxu3 %v794_v6  ;;  %537 = vmatpush.bf16.msra.mxu0 %v790_v9 }
  0x4e   :  { %556 = vmatpush.bf16.msra.mxu1 %v794_v6 }
  0x50   :  { %856 = vmatpush.bf16.msra.mxu2 %v782_v15 }
  0x51   :  { %864 = vmatpush.bf16.msra.mxu3 %v786_v12  ;;  %538 = vmatpush.bf16.msra.mxu0 %v782_v15 }
  0x52   :  { %557 = vmatpush.bf16.msra.mxu1 %v786_v12 }
  0x53   :  { %366 = vmatmul.bf16.gmra.mxu2 %v834_v24 }
  0x54   :  { %857 = vmatpush.bf16.msra.mxu2 %v774_v21  ;;  %287 = vmatmul.bf16.gmra.mxu0 %v832_v26 }
  0x55   :  { %865 = vmatpush.bf16.msra.mxu3 %v778_v18  ;;  %539 = vmatpush.bf16.msra.mxu0 %v774_v21 }
  0x56   :  { %558 = vmatpush.bf16.msra.mxu1 %v778_v18  ;;  %385 = vmatmul.bf16.gmra.mxu3 %v834_v24  ;;  %v1234_v18 = vperm.slane %v581_v10, 1 }
  0x57   :  { %306 = vmatmul.bf16.gmra.mxu1 %v832_v26 }
  0x58   :  { %858 = vmatpush.bf16.msra.mxu2 %v766_v29 }
  0x59   :  { %866 = vmatpush.bf16.msra.mxu3 %v770_v25  ;;  %540 = vmatpush.bf16.msra.mxu0 %v766_v29 }
  0x5a   :  { %559 = vmatpush.bf16.msra.mxu1 %v770_v25 }
  0x5c   :  { %859 = vmatpush.bf16.msra.mxu2 %v758_v35 }
  0x5d   :  { %867 = vmatpush.bf16.msra.mxu3 %v762_v32  ;;  %541 = vmatpush.bf16.msra.mxu0 %v758_v35 }
  0x5e   :  { %560 = vmatpush.bf16.msra.mxu1 %v762_v32 }
  0x60   :  { %860 = vmatpush.bf16.msra.mxu2 %v750_v39 }
  0x61   :  { %868 = vmatpush.bf16.msra.mxu3 %v754_v38  ;;  %542 = vmatpush.bf16.msra.mxu0 %v750_v39 }
  0x62   :  { %561 = vmatpush.bf16.msra.mxu1 %v754_v38 }
  0x63   :  { %548 = vmatmul.bf16.vlgmr.msra.gmra.mxu2 %v836_v40 }
  0x64   :  { %543 = vmatmul.bf16.vlgmr.msra.gmra.mxu0 %v835_v41 }
  0x66   :  { %567 = vmatmul.bf16.vlgmr.msra.gmra.mxu3 %v836_v40 }
  0x67   :  { %562 = vmatmul.bf16.vlgmr.msra.gmra.mxu1 %v835_v41 }
  0xa0   :  { %v141_v42 = vpop.f32.mrf.mxu0 }
  0xa1   :  { %v160_v43 = vpop.f32.mrf.mxu1 }
  0xa6   :  { %v204_v44 = vpop.f32.mrf.mxu2 }
  0xa7   :  { %v241_v8 = vmax.f32 %v141_v42, %v204_v44 }
  0xa8   :  { %v143_v46 = vpop.f32.mrf.mxu0 }
  0xa9   :  { %v223_v45 = vpop.f32.mrf.mxu3  ;;  %v162_v47 = vpop.f32.mrf.mxu1 }
  0xaa   :  { %v242_v9 = vmax.f32 %v160_v43, %v223_v45 }
  0xae   :  { %v206_v48 = vpop.f32.mrf.mxu2 }
  0xaf   :  { %v243_v24 = vmax.f32 %v143_v46, %v206_v48 }
  0xb0   :  { %v146_v50 = vpop.f32.mrf.mxu0 }
  0xb1   :  { %v225_v49 = vpop.f32.mrf.mxu3  ;;  %v165_v51 = vpop.f32.mrf.mxu1 }
  0xb2   :  { %v244_v25 = vmax.f32 %v162_v47, %v225_v49 }
  0xb6   :  { %v209_v52 = vpop.f32.mrf.mxu2 }
  0xb7   :  { %v245_v19 = vmax.f32 %v146_v50, %v209_v52 }
  0xb8   :  { %v1217_v54 = vpop.f32.mrf.mxu0 }
  0xb9   :  { %v228_v53 = vpop.f32.mrf.mxu3  ;;  %v1219_v55 = vpop.f32.mrf.mxu1 }
  0xba   :  { %v246_v26 = vmax.f32 %v165_v51, %v228_v53 }
  0xbe   :  { %v1221_v56 = vpop.f32.mrf.mxu2 }
  0xbf   :  { %v247_v44 = vmax.f32 %v1217_v54, %v1221_v56 }
  0xc1   :  { %v1223_v57 = vpop.f32.mrf.mxu3  ;;  %v283_v58 = vpop.f32.mrf.mxu0 }
  0xc2   :  { %v320_v11 = vmax.f32 %v241_v8, %v283_v58  ;;  %v248_v50 = vmax.f32 %v1219_v55, %v1223_v57 }
  0xc4   :  { %v302_v59 = vpop.f32.mrf.mxu1 }
  0xc5   :  { %v321_v12 = vmax.f32 %v242_v9, %v302_v59 }
  0xc6   :  { %v362_v60 = vpop.f32.mrf.mxu2 }
  0xc7   :  { %v399_v14 = vmax.f32 %v320_v11, %v362_v60 }
  0xc9   :  { %v381_v61 = vpop.f32.mrf.mxu3  ;;  %v285_v62 = vpop.f32.mrf.mxu0 }
  0xca   :  { %v400_v15 = vmax.f32 %v321_v12, %v381_v61  ;;  %v322_v30 = vmax.f32 %v243_v24, %v285_v62 }
  0xcc   :  { %v304_v63 = vpop.f32.mrf.mxu1 }
  0xcd   :  { %v323_v31 = vmax.f32 %v244_v25, %v304_v63 }
  0xce   :  { %v364_v0 = vpop.f32.mrf.mxu2 }
  0xcf   :  { %v401_v39 = vmax.f32 %v322_v30, %v364_v0 }
  0xd1   :  { %v383_v1 = vpop.f32.mrf.mxu3  ;;  %v288_v2 = vpop.f32.mrf.mxu0 }
  0xd2   :  { %v324_v27 = vmax.f32 %v245_v19, %v288_v2  ;;  %v402_v40 = vmax.f32 %v323_v31, %v383_v1 }
  0xd4   :  { %v307_v3 = vpop.f32.mrf.mxu1 }
  0xd5   :  { %v325_v32 = vmax.f32 %v246_v26, %v307_v3 }
  0xd6   :  { %v367_v4 = vpop.f32.mrf.mxu2 }
  0xd7   :  { %v403_v33 = vmax.f32 %v324_v27, %v367_v4 }
  0xd9   :  { %v386_v5 = vpop.f32.mrf.mxu3  ;;  %v290_v6 = vpop.f32.mrf.mxu0 }
  0xda   :  { %v404_v37 = vmax.f32 %v325_v32, %v386_v5  ;;  %v326_v53 = vmax.f32 %v247_v44, %v290_v6 }
  0xdc   :  { %v309_v7 = vpop.f32.mrf.mxu1 }
  0xdd   :  { %v327_v56 = vmax.f32 %v248_v50, %v309_v7 }
  0xde   :  { %v1228_v13 = vpop.f32.mrf.mxu2 }
  0xdf   :  { %v405_v61 = vmax.f32 %v326_v53, %v1228_v13 }
  0xe1   :  { %v1230_v16 = vpop.f32.mrf.mxu3  ;;  %v544_v20 = vpop.f32.mrf.mxu0 }
  0xe2   :  { %v573_v22 = vadd.f32 %v544_v20, %v399_v14  ;;  %v406_v1 = vmax.f32 %v327_v56, %v1230_v16 }
  0xe4   :  { %v563_v21 = vpop.f32.mrf.mxu1  ;;  %v587_v28 = vadd.f32 %v1232_v17, %v573_v22 }
  0xe5   :  { %v574_v23 = vadd.f32 %v563_v21, %v400_v15 }
  0xe6   :  { %vm595_vm0 = vcmp.gt.f32.partialorder %v587_v28, 0.0  ;;  %v603_v34 = vmul.f32 0.2, %v587_v28  ;;  %v549_v36 = vpop.f32.mrf.mxu2 }
  0xe7   :  { %v588_v29 = vadd.f32 %v1234_v18, %v574_v23  ;;  %v577_v38 = vadd.f32 %v549_v36, %v403_v33 }
  0xe8   :  { %v611_v41 = vsel %vm595_vm0, %v587_v28, %v603_v34 }
  0xe9   :  { %vm596_vm1 = vcmp.gt.f32.partialorder %v588_v29, 0.0  ;;  %v604_v35 = vmul.f32 0.2, %v588_v29  ;;  %v568_v43 = vpop.f32.mrf.mxu3  ;;  %v591_v46 = vadd.f32 %v1232_v17, %v577_v38  ;;  %v546_v48 = vpop.f32.mrf.mxu0 }
  0xea   :  { %v578_v47 = vadd.f32 %v568_v43, %v404_v37  ;;  %v575_v51 = vadd.f32 %v546_v48, %v401_v39 }
  0xeb   :  { %v612_v42 = vsel %vm596_vm1, %v588_v29, %v604_v35  ;;  %vm599_vm2 = vcmp.gt.f32.partialorder %v591_v46, 0.0  ;;  %v607_v58 = vmul.f32 0.2, %v591_v46 }
  0xec   :  { %v619_v45 = vpack.c.bf16 %v612_v42, %v611_v41  ;;  %v565_v49 = vpop.f32.mrf.mxu1  ;;  %v592_v54 = vadd.f32 %v1234_v18, %v578_v47  ;;  %v589_v59 = vadd.f32 %v1232_v17, %v575_v51 }
  0xed   :  { %v576_v52 = vadd.f32 %v565_v49, %v402_v40  ;;  %v615_v62 = vsel %vm599_vm2, %v591_v46, %v607_v58 }
  0xee   :  { %623 = vst [vmem:[%s1267_s5] sm:$0xff] %v619_v45  ;;  %vm600_vm3 = vcmp.gt.f32.partialorder %v592_v54, 0.0  ;;  %v608_v55 = vmul.f32 0.2, %v592_v54  ;;  %vm597_vm4 = vcmp.gt.f32.partialorder %v589_v59, 0.0  ;;  %v605_v57 = vmul.f32 0.2, %v589_v59  ;;  %v551_v0 = vpop.f32.mrf.mxu2 }
  0xef   :  { %v590_v60 = vadd.f32 %v1234_v18, %v576_v52  ;;  %v579_v3 = vadd.f32 %v551_v0, %v405_v61 }
  0xf0   :  { %v616_v2 = vsel %vm600_vm3, %v592_v54, %v608_v55  ;;  %v613_v5 = vsel %vm597_vm4, %v589_v59, %v605_v57 }
  0xf1   :  { %vm598_vm5 = vcmp.gt.f32.partialorder %v590_v60, 0.0  ;;  %v606_v63 = vmul.f32 0.2, %v590_v60  ;;  %v621_v4 = vpack.c.bf16 %v616_v2, %v615_v62  ;;  %v570_v7 = vpop.f32.mrf.mxu3  ;;  %v593_v9 = vadd.f32 %v1232_v17, %v579_v3 }
  0xf2   :  { %v580_v10 = vadd.f32 %v570_v7, %v406_v1 }
  0xf3   :  { %v614_v6 = vsel %vm598_vm5, %v590_v60, %v606_v63  ;;  %625 = vst [vmem:[%s1267_s5 + $0x10] sm:$0xff] %v621_v4  ;;  %vm601_vm6 = vcmp.gt.f32.partialorder %v593_v9, 0.0  ;;  %v609_v11 = vmul.f32 0.2, %v593_v9 }
  0xf4   :  { %v620_v8 = vpack.c.bf16 %v614_v6, %v613_v5  ;;  %v594_v12 = vadd.f32 %v1234_v18, %v580_v10 }
  0xf5   :  { %v617_v13 = vsel %vm601_vm6, %v593_v9, %v609_v11 }
  0xf6   :  { %624 = vst [vmem:[%s1267_s5 + $0x8] sm:$0xff] %v620_v8  ;;  %vm602_vm7 = vcmp.gt.f32.partialorder %v594_v12, 0.0  ;;  %v610_v14 = vmul.f32 0.2, %v594_v12 }
  0xf8   :  { %v618_v15 = vsel %vm602_vm7, %v594_v12, %v610_v14 }
  0xf9   :  { %v622_v16 = vpack.c.bf16 %v618_v15, %v617_v13 }
  0xfb   :  { %626 = vst [vmem:[%s1267_s5 + $0x18] sm:$0xff] %v622_v16 }

// kernel: dgcnn_forward.17
= control target key start
LH: loop header
LB: loop body
LE: loop exit
PB: predicated region body
PF: predicated region fallthrough
CT: control target
= control target key end

     0   :  { %s969_s0 = inlined_call_operand.vmem [shape: bf16[32,64], index: 0, kind: input, shape index: {}]   ;;  %s970_s1 = inlined_call_operand.vmem [shape: bf16[32,64], index: 1, kind: input, shape index: {}]   ;;  %s971_s2 = inlined_call_operand.vmem [shape: bf16[32,128], index: 2, kind: input, shape index: {}]   ;;  %s972_s3 = inlined_call_operand.vmem [shape: bf16[32,256], index: 3, kind: input, shape index: {}]   ;;  %s973_s4 = inlined_call_operand.vmem [shape: bf16[64,128], index: 4, kind: input, shape index: {}]   ;;  %s974_s5 = inlined_call_operand.vmem [shape: bf16[64,128], index: 5, kind: input, shape index: {}]   ;;  %s975_s6 = inlined_call_operand.vmem [shape: bf16[128,128], index: 6, kind: input, shape index: {}]   ;;  %s976_s7 = inlined_call_operand.vmem [shape: bf16[256,128], index: 7, kind: input, shape index: {}]   ;;  %s977_s8 = inlined_call_operand.vmem [shape: f32[1,128], index: 8, kind: input, shape index: {}]   ;;  %s978_s9 = inlined_call_operand.hbm [shape: f32[32,128], index: 9, kind: output, shape index: {}]  }
   0x1   :  { %v699_v0 = vld [vmem:[%s974_s5 + $0x18] sm:$0xff]  ;;  %v698_v4 = vld [vmem:[%s974_s5 + $0x10] sm:$0xff]  ;;  %v697_v8 = vld [vmem:[%s974_s5 + $0x8] sm:$0xff] }
   0x2   :  { %v693_v1 = vld [vmem:[%s973_s4 + $0x18] sm:$0xff]  ;;  %103 = vmatpush.bf16.msra.mxu0 %v699_v0  ;;  %v692_v5 = vld [vmem:[%s973_s4 + $0x10] sm:$0xff]  ;;  %v691_v9 = vld [vmem:[%s973_s4 + $0x8] sm:$0xff] }
   0x3   :  { %v709_v2 = vld [vmem:[%s975_s6 + $0x38] sm:$0xff]  ;;  %162 = vmatpush.bf16.msra.mxu1 %v693_v1  ;;  %v708_v6 = vld [vmem:[%s975_s6 + $0x30] sm:$0xff]  ;;  %v707_v10 = vld [vmem:[%s975_s6 + $0x28] sm:$0xff] }
   0x4   :  { %v721_v3 = vld [vmem:[%s976_s7 + $0x38] sm:$0xff]  ;;  %257 = vmatpush.bf16.msra.mxu2 %v709_v2  ;;  %v720_v7 = vld [vmem:[%s976_s7 + $0x30] sm:$0xff]  ;;  %v719_v11 = vld [vmem:[%s976_s7 + $0x28] sm:$0xff] }
   0x5   :  { %432 = vmatpush.bf16.msra.mxu3 %v721_v3  ;;  %v696_v12 = vld [vmem:[%s974_s5] sm:$0xff]  ;;  %v729_v17 = vld [vmem:[%s976_s7 + $0x78] sm:$0xff] }
   0x6   :  { %104 = vmatpush.bf16.msra.mxu0 %v698_v4  ;;  %v690_v13 = vld [vmem:[%s973_s4] sm:$0xff] }
   0x7   :  { %163 = vmatpush.bf16.msra.mxu1 %v692_v5  ;;  %v706_v14 = vld [vmem:[%s975_s6 + $0x20] sm:$0xff] }
   0x8   :  { %258 = vmatpush.bf16.msra.mxu2 %v708_v6  ;;  %v718_v15 = vld [vmem:[%s976_s7 + $0x20] sm:$0xff] }
   0x9   :  { %433 = vmatpush.bf16.msra.mxu3 %v720_v7  ;;  %v694_v16 = vld [vmem:[%s970_s1] sm:$0xff] }
   0xa   :  { %105 = vmatpush.bf16.msra.mxu0 %v697_v8  ;;  %v688_v18 = vld [vmem:[%s969_s0] sm:$0xff] }
   0xb   :  { %164 = vmatpush.bf16.msra.mxu1 %v691_v9 }
   0xc   :  { %259 = vmatpush.bf16.msra.mxu2 %v707_v10 }
   0xd   :  { %434 = vmatpush.bf16.msra.mxu3 %v719_v11 }
   0xe   :  { %14 = vsyncpa [#allocation3], 0  ;;  %106 = vmatpush.bf16.msra.mxu0 %v696_v12  ;;  %vm92_vm0 = vcmask 523264   ;;  %v705_v19 = vld [vmem:[%s975_s6 + $0x18] sm:$0xff]  ;;  %v728_v21 = vld [vmem:[%s976_s7 + $0x70] sm:$0xff]  ;;  %s504_s30 = sshll.u32 %s978_s9, 4  ;;  %s505_s30 = int_to_ptr.hbm [resolvable:$true] %s504_s30 }
   0xf   :  { %165 = vmatpush.bf16.msra.mxu1 %v690_v13  ;;  %v717_v20 = vld [vmem:[%s976_s7 + $0x18] sm:$0xff]  ;;  %v704_v22 = vld [vmem:[%s975_s6 + $0x10] sm:$0xff]  ;;  %v727_v24 = vld [vmem:[%s976_s7 + $0x68] sm:$0xff]  ;;  %s769_s10 = smov 128   ;;  %s770_s11 = smov 8  }
  0x10   :  { %260 = vmatpush.bf16.msra.mxu2 %v706_v14  ;;  %v716_v23 = vld [vmem:[%s976_s7 + $0x10] sm:$0xff]  ;;  %v703_v25 = vld [vmem:[%s975_s6 + $0x8] sm:$0xff]  ;;  %v726_v27 = vld [vmem:[%s976_s7 + $0x60] sm:$0xff] }
  0x11   :  { %435 = vmatpush.bf16.msra.mxu3 %v718_v15  ;;  %540 = vmatmul.msk.bf16.vlgmr.msra.gmra.mxu0 %vm92_vm0, %v694_v16  ;;  %v715_v26 = vld [vmem:[%s976_s7 + $0x8] sm:$0xff]  ;;  %v702_v28 = vld [vmem:[%s975_s6] sm:$0xff]  ;;  %v725_v32 = vld [vmem:[%s976_s7 + $0x58] sm:$0xff] }
  0x12   :  { %451 = vmatpush.bf16.msrb.mxu0 %v729_v17  ;;  %566 = vmatmul.msk.bf16.vlgmr.msra.gmra.mxu1 %vm92_vm0, %v688_v18  ;;  %v714_v29 = vld [vmem:[%s976_s7] sm:$0xff]  ;;  %v711_v31 = vld [vmem:[%s972_s3 + $0x4] sm:$0xf0]  ;;  %v724_v37 = vld [vmem:[%s976_s7 + $0x50] sm:$0xff] }
  0x13   :  { %730 = vmatpush.bf16.msrb.mxu1 %v729_v17  ;;  %v610_v30 = vld [vmem:[%s972_s3] sm:$0xf]  ;;  %v695_v33 = vld [vmem:[%s970_s1 + $0x8] sm:$0xff]  ;;  %v710_v40 = vld [vmem:[%s972_s3 + $0x4] sm:$0xf] }
  0x14   :  { %261 = vmatpush.bf16.msra.mxu2 %v705_v19  ;;  %v689_v34 = vld [vmem:[%s969_s0 + $0x8] sm:$0xff]  ;;  %v700_v35 = vld [vmem:[%s971_s2] sm:$0xff]  ;;  %v611_v36 = vor.u32 %v711_v31, %v610_v30  ;;  %v712_v42 = vld [vmem:[%s972_s3 + $0x14] sm:$0xf] }
  0x15   :  { %436 = vmatpush.bf16.msra.mxu3 %v717_v20  ;;  %v723_v38 = vld [vmem:[%s976_s7 + $0x48] sm:$0xff]  ;;  %v722_v39 = vld [vmem:[%s976_s7 + $0x40] sm:$0xff]  ;;  %v620_v43 = vld [vmem:[%s972_s3 + $0x18] sm:$0xf0] }
  0x16   :  { %452 = vmatpush.bf16.msrb.mxu0 %v728_v21  ;;  %v612_v41 = vld [vmem:[%s972_s3 + $0x8] sm:$0xf0]  ;;  %v618_v44 = vld [vmem:[%s972_s3 + $0x10] sm:$0xf]  ;;  %v713_v45 = vld [vmem:[%s972_s3 + $0x14] sm:$0xf0]  ;;  %v623_v47 = vor.u32 %v712_v42, %v620_v43 }
  0x17   :  { %731 = vmatpush.bf16.msrb.mxu1 %v728_v21  ;;  %v615_v46 = vor.u32 %v710_v40, %v612_v41  ;;  %v701_v48 = vld [vmem:[%s971_s2 + $0x8] sm:$0xff]  ;;  %v619_v49 = vor.u32 %v713_v45, %v618_v44  ;;  %v741_v2 = vld [vmem:[%s977_s8] ss:$0 sm:$0xff]  ;;  %s768_s8 = smov [#allocation2]  }
  0x18   :  { %262 = vmatpush.bf16.msra.mxu2 %v704_v22  ;;  %s502_s28 = sshll.u32 %s768_s8, 4  ;;  %s503_s28 = int_to_ptr.vmem [resolvable:$true] %s502_s28 }
  0x19   :  { %437 = vmatpush.bf16.msra.mxu3 %v716_v23 }
  0x1a   :  { %453 = vmatpush.bf16.msrb.mxu0 %v727_v24 }
  0x1b   :  { %732 = vmatpush.bf16.msrb.mxu1 %v727_v24 }
  0x1c   :  { %263 = vmatpush.bf16.msra.mxu2 %v703_v25 }
  0x1d   :  { %438 = vmatpush.bf16.msra.mxu3 %v715_v26 }
  0x1e   :  { %454 = vmatpush.bf16.msrb.mxu0 %v726_v27 }
  0x1f   :  { %733 = vmatpush.bf16.msrb.mxu1 %v726_v27 }
  0x20   :  { %264 = vmatpush.bf16.msra.mxu2 %v702_v28 }
  0x21   :  { %439 = vmatpush.bf16.msra.mxu3 %v714_v29  ;;  %541 = vmatmul.msk.bf16.gmra.mxu0 %vm92_vm0, %v695_v33 }
  0x22   :  { %455 = vmatpush.bf16.msrb.mxu0 %v725_v32  ;;  %567 = vmatmul.msk.bf16.gmra.mxu1 %vm92_vm0, %v689_v34 }
  0x23   :  { %734 = vmatpush.bf16.msrb.mxu1 %v725_v32  ;;  %265 = vmatmul.bf16.vlgmr.msra.gmra.mxu2 %v700_v35 }
  0x24   :  { %440 = vmatmul.bf16.vlgmr.msra.gmra.mxu3 %v611_v36 }
  0x26   :  { %456 = vmatpush.bf16.msrb.mxu0 %v724_v37 }
  0x27   :  { %735 = vmatpush.bf16.msrb.mxu1 %v724_v37 }
  0x2a   :  { %457 = vmatpush.bf16.msrb.mxu0 %v723_v38 }
  0x2b   :  { %736 = vmatpush.bf16.msrb.mxu1 %v723_v38 }
  0x2e   :  { %458 = vmatpush.bf16.msrb.mxu0 %v722_v39 }
  0x2f   :  { %737 = vmatpush.bf16.msrb.mxu1 %v722_v39 }
  0x31   :  { %459 = vmatmul.bf16.vlgmr.msrb.gmra.mxu0 %v615_v46 }
  0x32   :  { %464 = vmatmul.bf16.vlgmr.msrb.gmra.mxu1 %v623_v47 }
  0x33   :  { %270 = vmatmul.bf16.gmra.mxu2 %v701_v48 }
  0x34   :  { %445 = vmatmul.bf16.gmra.mxu3 %v619_v49 }
  0x8e   :  { %v108_v50 = vpop.f32.mrf.mxu0 }
  0x8f   :  { %v167_v51 = vpop.f32.mrf.mxu1 }
  0x90   :  { %v168_v60 = vadd.f32 %v167_v51, %v108_v50 }
  0x96   :  { %v110_v52 = vpop.f32.mrf.mxu0 }
  0x97   :  { %v169_v53 = vpop.f32.mrf.mxu1 }
  0x98   :  { %v170_v7 = vadd.f32 %v169_v53, %v110_v52 }
  0x9e   :  { %v113_v54 = vpop.f32.mrf.mxu0 }
  0x9f   :  { %v172_v55 = vpop.f32.mrf.mxu1 }
  0xa0   :  { %v173_v6 = vadd.f32 %v172_v55, %v113_v54 }
  0xa6   :  { %v266_v56 = vpop.f32.mrf.mxu2  ;;  %v115_v58 = vpop.f32.mrf.mxu0 }
  0xa7   :  { %v441_v57 = vpop.f32.mrf.mxu3  ;;  %v174_v59 = vpop.f32.mrf.mxu1  ;;  %v276_v0 = vadd.f32 %v266_v56, %v168_v60 }
  0xa8   :  { %v175_v21 = vadd.f32 %v174_v59, %v115_v58 }
  0xae   :  { %v268_v61 = vpop.f32.mrf.mxu2  ;;  %v460_v63 = vpop.f32.mrf.mxu0 }
  0xaf   :  { %v443_v62 = vpop.f32.mrf.mxu3  ;;  %v461_v1 = vadd.f32 %v460_v63, %v441_v57  ;;  %v465_v4 = vpop.f32.mrf.mxu1  ;;  %v277_v14 = vadd.f32 %v268_v61, %v170_v7 }
  0xb1   :  { %v470_v3 = vadd.f32 %v461_v1, %v276_v0 }
  0xb3   :  { %v478_v5 = vadd.f32 %v741_v2, %v470_v3 }
  0xb5   :  { %vm482_vm1 = vcmp.gt.f32.partialorder %v478_v5, 0.0  ;;  %v486_v8 = vmul.f32 0.2, %v478_v5 }
  0xb6   :  { %v271_v9 = vpop.f32.mrf.mxu2  ;;  %v462_v13 = vpop.f32.mrf.mxu0 }
  0xb7   :  { %v446_v10 = vpop.f32.mrf.mxu3  ;;  %v278_v11 = vadd.f32 %v271_v9, %v173_v6  ;;  %v490_v15 = vsel %vm482_vm1, %v478_v5, %v486_v8  ;;  %v463_v16 = vadd.f32 %v462_v13, %v443_v62  ;;  %v467_v23 = vpop.f32.mrf.mxu1 }
  0xb8   :  { %v466_v12 = vadd.f32 %v465_v4, %v446_v10  ;;  %494 = vst [vmem:[#allocation2] sm:$0xff] %v490_v15 }
  0xb9   :  { %v471_v18 = vadd.f32 %v463_v16, %v277_v14 }
  0xba   :  { %v472_v17 = vadd.f32 %v466_v12, %v278_v11 }
  0xbb   :  { %v479_v20 = vadd.f32 %v741_v2, %v471_v18 }
  0xbc   :  { %v480_v19 = vadd.f32 %v741_v2, %v472_v17 }
  0xbd   :  { %vm483_vm3 = vcmp.gt.f32.partialorder %v479_v20, 0.0  ;;  %v487_v24 = vmul.f32 0.2, %v479_v20 }
  0xbe   :  { %vm484_vm2 = vcmp.gt.f32.partialorder %v480_v19, 0.0  ;;  %v488_v22 = vmul.f32 0.2, %v480_v19  ;;  %v273_v25 = vpop.f32.mrf.mxu2 }
  0xbf   :  { %v448_v26 = vpop.f32.mrf.mxu3  ;;  %v279_v28 = vadd.f32 %v273_v25, %v175_v21  ;;  %v491_v30 = vsel %vm483_vm3, %v479_v20, %v487_v24 }
  0xc0   :  { %v492_v27 = vsel %vm484_vm2, %v480_v19, %v488_v22  ;;  %v468_v29 = vadd.f32 %v467_v23, %v448_v26  ;;  %495 = vst [vmem:[#allocation2 + $0x8] sm:$0xff] %v491_v30 }
  0xc1   :  { %496 = vst [vmem:[#allocation2 + $0x10] sm:$0xff] %v492_v27 }
  0xc2   :  { %v473_v31 = vadd.f32 %v468_v29, %v279_v28 }
  0xc4   :  { %v481_v32 = vadd.f32 %v741_v2, %v473_v31 }
  0xc6   :  { %vm485_vm4 = vcmp.gt.f32.partialorder %v481_v32, 0.0  ;;  %v489_v33 = vmul.f32 0.2, %v481_v32 }
  0xc8   :  { %v493_v34 = vsel %vm485_vm4, %v481_v32, %v489_v33 }
  0xc9   :  { %497 = vst [vmem:[#allocation2 + $0x18] sm:$0xff] %v493_v34 }
  0xca   :  { %510 = dma.vmem_to_hbm [thread:$0]  %s503_s28, 512, %s505_s30, [#allocation3], %s769_s10, %s769_s10, %s770_s11  }
  0xcb   :  { %766 = dma.done.wait [#allocation3], 512  }
  0xcc   :  { %767 = vsyncadd [#allocation3], 4294966784 }
  0xcd   :  { %515 = vsyncpa [#allocation3], 1 }

</bundles_post_ra>
